<compile_context>
chip_gen: v7x
topology: tpu7x:2x2x1
jax: 0.10.0
libtpu: 0.0.40
codegen_flags: <defaults>
</compile_context>

<pallas_src>
import jax
import jax.numpy as jnp
from jax.experimental import pallas as pl
from jax.experimental.pallas import tpu as pltpu


def make_resblock_kernel(N, H, W, Qpad, has_downsample, eps=1e-5):
    inv_cnt = 1.0 / float(N * H * W)
    f32 = jnp.float32

    def conv_rows(src, wb_ref):
        # src: (Qpad, K) f32 slab; wb_ref: (3, K, L2p) banded weights in the
        # conv dtype, one band per vertical tap dh = -1, 0, +1:
        #   out[q, :] = sum_dh src[q + dh, :] @ wb[dh + 1]
        # Rolls stay on f32 (no packed-bf16 sublane roll); the LHS is cast to
        # the weight dtype at each dot so the MXU runs at bf16 rate.
        wdt = wb_ref.dtype
        acc = jnp.dot(src.astype(wdt), wb_ref[1], preferred_element_type=f32)
        up = pltpu.roll(src, shift=Qpad - 1, axis=0)          # up[q] = src[q + 1]
        acc = acc + jnp.dot(up.astype(wdt), wb_ref[2], preferred_element_type=f32)
        dn = pltpu.roll(src, shift=1, axis=0)                 # dn[q] = src[q - 1]
        acc = acc + jnp.dot(dn.astype(wdt), wb_ref[0], preferred_element_type=f32)
        return acc

    def kernel(*refs):
        if has_downsample:
            (x_ref, wb1_ref, wb2_ref, wbd_ref, sel_ref, bc_ref, rmr_ref, rmc_ref,
             g1_ref, bt1_ref, g2_ref, bt2_ref, gd_ref, btd_ref, o_ref) = refs
        else:
            (x_ref, wb1_ref, wb2_ref, sel_ref, bc_ref, rmr_ref, rmc_ref,
             g1_ref, bt1_ref, g2_ref, bt2_ref, o_ref) = refs

        x = x_ref[...]                    # (Qpad, L1p) f32 padded row slab
        sel = sel_ref[...]                # (L2p, P)  interior-(w,c) -> channel gather
        bc = bc_ref[...]                  # (P, L2p)  channel -> interior-(w,c) scatter
        rm_row = rmr_ref[...]             # (1, Qpad) interior-row mask (reductions)
        rm_col = rmc_ref[...]             # (Qpad, 1) interior-row mask (elementwise)

        def bn_scale_shift(z, g, b):
            # Training-mode BN folded into one per-channel scale/shift pair.
            # One-pass masked stats: the two lane reductions are independent,
            # as are the two channel reductions, so the serialized MXU chain
            # is 3 small matmuls deep.
            lane_sum = jnp.dot(rm_row, z, preferred_element_type=f32)          # (1, L2p)
            lane_ssq = jnp.dot(rm_row, z * z, preferred_element_type=f32)      # (1, L2p)
            mu = jnp.dot(lane_sum, sel, preferred_element_type=f32) * inv_cnt  # (1, P)
            ex2 = jnp.dot(lane_ssq, sel, preferred_element_type=f32) * inv_cnt # (1, P)
            var = ex2 - mu * mu                                                # biased
            scale = g * jax.lax.rsqrt(var + eps)                               # (1, P)
            shift = b - scale * mu                                             # (1, P)
            # Scatter back to lanes; w-padding / lane-padding lanes get
            # scale = shift = 0 (keeps post-BN activations zero there --
            # required so conv2's horizontal taps see zeros on pad columns).
            return (jnp.dot(scale, bc, preferred_element_type=f32),
                    jnp.dot(shift, bc, preferred_element_type=f32))

        # conv1 (3x3, pad 1) -> BN -> ReLU   (conv bias dropped: BN(z+b) == BN(z))
        z1 = conv_rows(x, wb1_ref)
        sc1, sh1 = bn_scale_shift(z1, g1_ref[...], bt1_ref[...])
        h = jnp.maximum(z1 * sc1 + sh1, 0.0) * rm_col   # re-zero pad rows for conv2

        # conv2 (3x3, pad 1) -> BN
        z2 = conv_rows(h, wb2_ref)
        sc2, sh2 = bn_scale_shift(z2, g2_ref[...], bt2_ref[...])
        out = z2 * sc2 + sh2

        # residual branch: 1x1 conv (no bias) -> BN, or identity
        if has_downsample:
            zd = jnp.dot(x.astype(wbd_ref.dtype), wbd_ref[...],
                         preferred_element_type=f32)
            scd, shd = bn_scale_shift(zd, gd_ref[...], btd_ref[...])
            res = zd * scd + shd
        else:
            res = x                        # identity (requires Cin == P), f32

        o_ref[...] = jnp.maximum(out + res, 0.0)

    return kernel


def _band_weights_3x3(w, W, Wp):
    # w: (Cout, Cin, 3, 3) OIHW -> (3, Wp*Cin, Wp*Cout) banded matrices (dh=-1,0,+1).
    # Horizontal taps and zero padding are folded into the band; output
    # w-padding columns are zeroed so conv outputs stay zero on pad lanes.
    wk = jnp.transpose(w, (2, 3, 1, 0))                    # (kh, kw, Cin, Cout)
    wp_in = jnp.arange(Wp)[:, None]
    wp_out = jnp.arange(Wp)[None, :]
    dw = wp_in - wp_out                                    # (Wp, Wp)
    valid = ((jnp.abs(dw) <= 1) & (wp_out >= 1) & (wp_out <= W)).astype(w.dtype)
    taps = wk[:, jnp.clip(dw + 1, 0, 2), :, :]             # (3, Wp_in, Wp_out, Cin, Cout)
    taps = taps * valid[None, :, :, None, None]
    taps = jnp.transpose(taps, (0, 1, 3, 2, 4))            # (3, Wp_in, Cin, Wp_out, Cout)
    return taps.reshape(3, Wp * w.shape[1], Wp * w.shape[0])


def _band_weight_1x1(wd, W, Wp):
    # wd: (Cout, Cin, 1, 1) -> (Wp*Cin, Wp*Cout) block-diagonal band (1x1 conv).
    Cout, Cin = wd.shape[0], wd.shape[1]
    wp = jnp.arange(Wp)
    diag = ((wp[:, None] == wp[None, :]) & (wp[None, :] >= 1)
            & (wp[None, :] <= W)).astype(wd.dtype)          # (Wp_in, Wp_out)
    band = diag[:, None, :, None] * wd[:, :, 0, 0].T[None, :, None, :]
    return band.reshape(Wp * Cin, Wp * Cout)


def resblock_forward(x_nchw, params, stride=1, conv_dtype=jnp.bfloat16):
    """x_nchw: (N, Cin, H, W) float32. Returns (N, P, H, W) float32."""
    assert stride == 1, "TODO(synk): stride > 1 not implemented in the kernel"
    N, Cin, H, W = x_nchw.shape
    P = params["w1"].shape[0]
    has_ds = (Cin != P) or (stride != 1)
    if not has_ds:
        assert Cin == P, "identity residual requires Cin == P"

    Hp, Wp = H + 2, W + 2
    Q = N * Hp
    Qpad = ((Q + 15) // 16) * 16                         # 16: bf16 sublane packing
    L1, L2 = Wp * Cin, Wp * P
    L1p = ((L1 + 127) // 128) * 128                      # lane-dense / MXU-granular
    L2p = ((L2 + 127) // 128) * 128
    f32 = jnp.float32
    row = lambda v: v.reshape(1, -1).astype(f32)

    # ---- wrapper-side layout plumbing (pure XLA, off the TensorCore path) ----
    x_nhwc = jnp.transpose(x_nchw, (0, 2, 3, 1)).astype(f32)
    xp = jnp.pad(x_nhwc, ((0, 0), (1, 1), (1, 1), (0, 0)))             # (N,Hp,Wp,Cin)
    xslab = jnp.pad(xp.reshape(Q, L1), ((0, Qpad - Q), (0, L1p - L1)))  # f32 slab

    wb1 = _band_weights_3x3(params["w1"].astype(f32), W, Wp)            # (3, L1, L2)
    wb1 = jnp.pad(wb1, ((0, 0), (0, L1p - L1), (0, L2p - L2))).astype(conv_dtype)
    wb2 = _band_weights_3x3(params["w2"].astype(f32), W, Wp)            # (3, L2, L2)
    wb2 = jnp.pad(wb2, ((0, 0), (0, L2p - L2), (0, L2p - L2))).astype(conv_dtype)

    # channel gather / scatter matrices (zero on w-padding and lane-padding lanes)
    wp_int = ((jnp.arange(Wp) >= 1) & (jnp.arange(Wp) <= W)).astype(f32)    # (Wp,)
    sel = (wp_int[:, None, None] * jnp.eye(P, dtype=f32)[None]).reshape(L2, P)
    sel = jnp.pad(sel, ((0, L2p - L2), (0, 0)))                         # (L2p, P)
    bc = sel.T                                                          # (P, L2p)

    # interior-row mask (zero for h-padding rows and the Qpad tail)
    hp = jnp.arange(Q) % Hp
    rmask = jnp.pad(((hp >= 1) & (hp <= H)).astype(f32), (0, Qpad - Q))
    rm_row = rmask[None, :]                                             # (1, Qpad)
    rm_col = rmask[:, None]                                             # (Qpad, 1)

    operands = [xslab, wb1, wb2]
    if has_ds:
        wbd = _band_weight_1x1(params["wd"].astype(f32), W, Wp)         # (L1, L2)
        wbd = jnp.pad(wbd, ((0, L1p - L1), (0, L2p - L2))).astype(conv_dtype)
        operands.append(wbd)
    operands += [sel, bc, rm_row, rm_col,
                 row(params["g1"]), row(params["bt1"]),
                 row(params["g2"]), row(params["bt2"])]
    if has_ds:
        operands += [row(params["gd"]), row(params["btd"])]

    conv_flops = 2 * Qpad * L2p * (3 * L1p + 3 * L2p + (L1p if has_ds else 0))
    bn_flops = (3 if has_ds else 2) * 8 * Qpad * L2p
    bytes_accessed = sum(int(o.size) * o.dtype.itemsize for o in operands) \
        + Qpad * L2p * 4

    kernel = make_resblock_kernel(N, H, W, Qpad, has_ds)
    vmem = pl.BlockSpec(memory_space=pltpu.MemorySpace.VMEM)

    out_slab = pl.pallas_call(
        kernel,
        out_shape=jax.ShapeDtypeStruct((Qpad, L2p), f32),
        in_specs=[vmem] * len(operands),
        out_specs=vmem,
        compiler_params=pltpu.CompilerParams(
            # TODO(synk): re-derive for v7x (64 MiB physical) once row-tiled.
            vmem_limit_bytes=32 * 1024 * 1024),
        cost_estimate=pl.CostEstimate(flops=conv_flops + bn_flops,
                                      transcendentals=(3 if has_ds else 2) * P,
                                      bytes_accessed=bytes_accessed),
    )(*operands)

    out = out_slab[:Q, :L2].reshape(N, Hp, Wp, P)[:, 1:H + 1, 1:W + 1, :]
    return jnp.transpose(out, (0, 3, 1, 2))


def torch_like_reference(x, p, stride=1):
    """Pure-JAX reference mirroring the PyTorch forward (training-mode BN)."""
    def conv(x, w, b=None, s=1, pad=1):
        o = jax.lax.conv_general_dilated(
            x, w, (s, s), ((pad, pad), (pad, pad)),
            dimension_numbers=("NCHW", "OIHW", "NCHW"))
        if b is not None:
            o = o + b[None, :, None, None]
        return o

    def bn(x, g, b, eps=1e-5):
        mu = x.mean(axis=(0, 2, 3), keepdims=True)
        var = ((x - mu) ** 2).mean(axis=(0, 2, 3), keepdims=True)
        return (g[None, :, None, None] * (x - mu) / jnp.sqrt(var + eps)
                + b[None, :, None, None])

    out = conv(x, p["w1"], p["b1"], stride, 1)
    out = jax.nn.relu(bn(out, p["g1"], p["bt1"]))
    out = conv(out, p["w2"], p["b2"], 1, 1)
    out = bn(out, p["g2"], p["bt2"])
    res = conv(x, p["wd"], None, stride, 0)
    res = bn(res, p["gd"], p["btd"])
    return jax.nn.relu(out + res)


if __name__ == "__main__":
    # Small shapes consistent with the module: inplanes=4, planes=8, stride=1
    # (inplanes != planes -> downsample branch is active).
    N, Cin, H, W, P = 2, 4, 16, 16, 8

    key = jax.random.PRNGKey(0)
    ks = jax.random.split(key, 12)
    params = {
        "w1":  0.1 * jax.random.normal(ks[0], (P, Cin, 3, 3), jnp.float32),
        "b1":  0.1 * jax.random.normal(ks[1], (P,), jnp.float32),
        "g1":  1.0 + 0.1 * jax.random.normal(ks[2], (P,), jnp.float32),
        "bt1": 0.1 * jax.random.normal(ks[3], (P,), jnp.float32),
        "w2":  0.1 * jax.random.normal(ks[4], (P, P, 3, 3), jnp.float32),
        "b2":  0.1 * jax.random.normal(ks[5], (P,), jnp.float32),
        "g2":  1.0 + 0.1 * jax.random.normal(ks[6], (P,), jnp.float32),
        "bt2": 0.1 * jax.random.normal(ks[7], (P,), jnp.float32),
        "wd":  0.1 * jax.random.normal(ks[8], (P, Cin, 1, 1), jnp.float32),
        "gd":  1.0 + 0.1 * jax.random.normal(ks[9], (P,), jnp.float32),
        "btd": 0.1 * jax.random.normal(ks[10], (P,), jnp.float32),
    }
    x = jax.random.normal(ks[11], (N, Cin, H, W), jnp.float32)

    # Default path: bf16 conv matmuls (f32 accumulation, f32 BN).
    out_bf16 = jax.block_until_ready(resblock_forward(x, params, stride=1))
    # f32 conv path: exact-parity check against the pure-JAX reference.
    out_f32 = jax.block_until_ready(
        resblock_forward(x, params, stride=1, conv_dtype=jnp.float32))

    ref = torch_like_reference(x, params, stride=1)
    err_f32 = float(jnp.max(jnp.abs(out_f32 - ref)))
    assert err_f32 < 1e-3, f"f32 path mismatch vs reference: {err_f32}"
    rel_bf16 = float(jnp.max(jnp.abs(out_bf16 - ref))
                     / (jnp.max(jnp.abs(ref)) + 1e-6))
    assert rel_bf16 < 3e-2, f"bf16 path mismatch vs reference: rel={rel_bf16}"

    print("KERNEL_OK")
</pallas_src>

<mosaic_0001>
module attributes {stable_mosaic.version = 11 : i64} {
  func.func @kernel(%arg0: memref<48x128xf32, #tpu.memory_space<vmem>>, %arg1: memref<3x128x256xbf16, #tpu.memory_space<vmem>>, %arg2: memref<3x256x256xbf16, #tpu.memory_space<vmem>>, %arg3: memref<128x256xbf16, #tpu.memory_space<vmem>>, %arg4: memref<256x8xf32, #tpu.memory_space<vmem>>, %arg5: memref<8x256xf32, #tpu.memory_space<vmem>>, %arg6: memref<1x48xf32, #tpu.memory_space<vmem>>, %arg7: memref<48x1xf32, #tpu.memory_space<vmem>>, %arg8: memref<1x8xf32, #tpu.memory_space<vmem>>, %arg9: memref<1x8xf32, #tpu.memory_space<vmem>>, %arg10: memref<1x8xf32, #tpu.memory_space<vmem>>, %arg11: memref<1x8xf32, #tpu.memory_space<vmem>>, %arg12: memref<1x8xf32, #tpu.memory_space<vmem>>, %arg13: memref<1x8xf32, #tpu.memory_space<vmem>>, %arg14: memref<48x256xf32, #tpu.memory_space<vmem>>) attributes {dimension_semantics = [], scalar_prefetch = 0 : i64, scratch_operands = 0 : i64, tpu.core_type = #tpu.core_type<tc>} {
    %c0 = arith.constant 0 : index
    %c0_0 = arith.constant 0 : index
    %0 = vector.load %arg0[%c0, %c0_0] : memref<48x128xf32, #tpu.memory_space<vmem>>, vector<48x128xf32>
    %c0_1 = arith.constant 0 : index
    %c0_2 = arith.constant 0 : index
    %1 = vector.load %arg4[%c0_1, %c0_2] : memref<256x8xf32, #tpu.memory_space<vmem>>, vector<256x8xf32>
    %c0_3 = arith.constant 0 : index
    %c0_4 = arith.constant 0 : index
    %2 = vector.load %arg5[%c0_3, %c0_4] : memref<8x256xf32, #tpu.memory_space<vmem>>, vector<8x256xf32>
    %c0_5 = arith.constant 0 : index
    %c0_6 = arith.constant 0 : index
    %3 = vector.load %arg6[%c0_5, %c0_6] : memref<1x48xf32, #tpu.memory_space<vmem>>, vector<1x48xf32>
    %c0_7 = arith.constant 0 : index
    %c0_8 = arith.constant 0 : index
    %4 = vector.load %arg7[%c0_7, %c0_8] : memref<48x1xf32, #tpu.memory_space<vmem>>, vector<48x1xf32>
    %5 = arith.truncf %0 : vector<48x128xf32> to vector<48x128xbf16>
    %c1 = arith.constant 1 : index
    %c0_9 = arith.constant 0 : index
    %c0_10 = arith.constant 0 : index
    %6 = vector.load %arg1[%c1, %c0_9, %c0_10] : memref<3x128x256xbf16, #tpu.memory_space<vmem>>, vector<1x128x256xbf16>
    %7 = vector.shape_cast %6 : vector<1x128x256xbf16> to vector<128x256xbf16>
    %cst = arith.constant dense<0.000000e+00> : vector<48x256xf32>
    %8 = tpu.matmul %5, %7, %cst {dimension_numbers = #tpu.dot_dimension_numbers<[1], [0], [0], [1], [0, 0, 1, 1], [], []>} : vector<48x128xbf16>, vector<128x256xbf16>, vector<48x256xf32> -> vector<48x256xf32>
    %c47_i32 = arith.constant 47 : i32
    %9 = tpu.dynamic_rotate %0 by %c47_i32 dim 0 : vector<48x128xf32>, i32 -> vector<48x128xf32>
    %10 = arith.truncf %9 : vector<48x128xf32> to vector<48x128xbf16>
    %c2 = arith.constant 2 : index
    %c0_11 = arith.constant 0 : index
    %c0_12 = arith.constant 0 : index
    %11 = vector.load %arg1[%c2, %c0_11, %c0_12] : memref<3x128x256xbf16, #tpu.memory_space<vmem>>, vector<1x128x256xbf16>
    %12 = vector.shape_cast %11 : vector<1x128x256xbf16> to vector<128x256xbf16>
    %cst_13 = arith.constant dense<0.000000e+00> : vector<48x256xf32>
    %13 = tpu.matmul %10, %12, %cst_13 {dimension_numbers = #tpu.dot_dimension_numbers<[1], [0], [0], [1], [0, 0, 1, 1], [], []>} : vector<48x128xbf16>, vector<128x256xbf16>, vector<48x256xf32> -> vector<48x256xf32>
    %14 = arith.addf %8, %13 : vector<48x256xf32>
    %c1_i32 = arith.constant 1 : i32
    %15 = tpu.dynamic_rotate %0 by %c1_i32 dim 0 : vector<48x128xf32>, i32 -> vector<48x128xf32>
    %16 = arith.truncf %15 : vector<48x128xf32> to vector<48x128xbf16>
    %c0_14 = arith.constant 0 : index
    %c0_15 = arith.constant 0 : index
    %c0_16 = arith.constant 0 : index
    %17 = vector.load %arg1[%c0_14, %c0_15, %c0_16] : memref<3x128x256xbf16, #tpu.memory_space<vmem>>, vector<1x128x256xbf16>
    %18 = vector.shape_cast %17 : vector<1x128x256xbf16> to vector<128x256xbf16>
    %cst_17 = arith.constant dense<0.000000e+00> : vector<48x256xf32>
    %19 = tpu.matmul %16, %18, %cst_17 {dimension_numbers = #tpu.dot_dimension_numbers<[1], [0], [0], [1], [0, 0, 1, 1], [], []>} : vector<48x128xbf16>, vector<128x256xbf16>, vector<48x256xf32> -> vector<48x256xf32>
    %20 = arith.addf %14, %19 : vector<48x256xf32>
    %c0_18 = arith.constant 0 : index
    %c0_19 = arith.constant 0 : index
    %21 = vector.load %arg8[%c0_18, %c0_19] : memref<1x8xf32, #tpu.memory_space<vmem>>, vector<1x8xf32>
    %c0_20 = arith.constant 0 : index
    %c0_21 = arith.constant 0 : index
    %22 = vector.load %arg9[%c0_20, %c0_21] : memref<1x8xf32, #tpu.memory_space<vmem>>, vector<1x8xf32>
    %cst_22 = arith.constant dense<0.000000e+00> : vector<1x256xf32>
    %23 = tpu.matmul %3, %20, %cst_22 {dimension_numbers = #tpu.dot_dimension_numbers<[1], [0], [0], [1], [0, 0, 1, 1], [], []>} : vector<1x48xf32>, vector<48x256xf32>, vector<1x256xf32> -> vector<1x256xf32>
    %24 = arith.mulf %20, %20 : vector<48x256xf32>
    %cst_23 = arith.constant dense<0.000000e+00> : vector<1x256xf32>
    %25 = tpu.matmul %3, %24, %cst_23 {dimension_numbers = #tpu.dot_dimension_numbers<[1], [0], [0], [1], [0, 0, 1, 1], [], []>} : vector<1x48xf32>, vector<48x256xf32>, vector<1x256xf32> -> vector<1x256xf32>
    %cst_24 = arith.constant dense<0.000000e+00> : vector<1x8xf32>
    %26 = tpu.matmul %23, %1, %cst_24 {dimension_numbers = #tpu.dot_dimension_numbers<[1], [0], [0], [1], [0, 0, 1, 1], [], []>} : vector<1x256xf32>, vector<256x8xf32>, vector<1x8xf32> -> vector<1x8xf32>
    %cst_25 = arith.constant 0.001953125 : f32
    %27 = vector.broadcast %cst_25 : f32 to vector<1x8xf32>
    %28 = arith.mulf %26, %27 : vector<1x8xf32>
    %cst_26 = arith.constant dense<0.000000e+00> : vector<1x8xf32>
    %29 = tpu.matmul %25, %1, %cst_26 {dimension_numbers = #tpu.dot_dimension_numbers<[1], [0], [0], [1], [0, 0, 1, 1], [], []>} : vector<1x256xf32>, vector<256x8xf32>, vector<1x8xf32> -> vector<1x8xf32>
    %cst_27 = arith.constant 0.001953125 : f32
    %30 = vector.broadcast %cst_27 : f32 to vector<1x8xf32>
    %31 = arith.mulf %29, %30 : vector<1x8xf32>
    %32 = arith.mulf %28, %28 : vector<1x8xf32>
    %33 = arith.subf %31, %32 : vector<1x8xf32>
    %cst_28 = arith.constant 9.99999974E-6 : f32
    %34 = vector.broadcast %cst_28 : f32 to vector<1x8xf32>
    %35 = arith.addf %33, %34 : vector<1x8xf32>
    %36 = math.rsqrt %35 : vector<1x8xf32>
    %37 = arith.mulf %21, %36 : vector<1x8xf32>
    %38 = arith.mulf %37, %28 : vector<1x8xf32>
    %39 = arith.subf %22, %38 : vector<1x8xf32>
    %cst_29 = arith.constant dense<0.000000e+00> : vector<1x256xf32>
    %40 = tpu.matmul %37, %2, %cst_29 {dimension_numbers = #tpu.dot_dimension_numbers<[1], [0], [0], [1], [0, 0, 1, 1], [], []>} : vector<1x8xf32>, vector<8x256xf32>, vector<1x256xf32> -> vector<1x256xf32>
    %cst_30 = arith.constant dense<0.000000e+00> : vector<1x256xf32>
    %41 = tpu.matmul %39, %2, %cst_30 {dimension_numbers = #tpu.dot_dimension_numbers<[1], [0], [0], [1], [0, 0, 1, 1], [], []>} : vector<1x8xf32>, vector<8x256xf32>, vector<1x256xf32> -> vector<1x256xf32>
    %42 = vector.broadcast %40 : vector<1x256xf32> to vector<48x256xf32>
    %43 = arith.mulf %20, %42 : vector<48x256xf32>
    %44 = vector.broadcast %41 : vector<1x256xf32> to vector<48x256xf32>
    %45 = arith.addf %43, %44 : vector<48x256xf32>
    %cst_31 = arith.constant 0.000000e+00 : f32
    %46 = vector.broadcast %cst_31 : f32 to vector<48x256xf32>
    %47 = arith.maximumf %45, %46 : vector<48x256xf32>
    %48 = vector.broadcast %4 : vector<48x1xf32> to vector<48x256xf32>
    %49 = arith.mulf %47, %48 : vector<48x256xf32>
    %50 = arith.truncf %49 : vector<48x256xf32> to vector<48x256xbf16>
    %c1_32 = arith.constant 1 : index
    %c0_33 = arith.constant 0 : index
    %c0_34 = arith.constant 0 : index
    %51 = vector.load %arg2[%c1_32, %c0_33, %c0_34] : memref<3x256x256xbf16, #tpu.memory_space<vmem>>, vector<1x256x256xbf16>
    %52 = vector.shape_cast %51 : vector<1x256x256xbf16> to vector<256x256xbf16>
    %cst_35 = arith.constant dense<0.000000e+00> : vector<48x256xf32>
    %53 = tpu.matmul %50, %52, %cst_35 {dimension_numbers = #tpu.dot_dimension_numbers<[1], [0], [0], [1], [0, 0, 1, 1], [], []>} : vector<48x256xbf16>, vector<256x256xbf16>, vector<48x256xf32> -> vector<48x256xf32>
    %c47_i32_36 = arith.constant 47 : i32
    %54 = tpu.dynamic_rotate %49 by %c47_i32_36 dim 0 : vector<48x256xf32>, i32 -> vector<48x256xf32>
    %55 = arith.truncf %54 : vector<48x256xf32> to vector<48x256xbf16>
    %c2_37 = arith.constant 2 : index
    %c0_38 = arith.constant 0 : index
    %c0_39 = arith.constant 0 : index
    %56 = vector.load %arg2[%c2_37, %c0_38, %c0_39] : memref<3x256x256xbf16, #tpu.memory_space<vmem>>, vector<1x256x256xbf16>
    %57 = vector.shape_cast %56 : vector<1x256x256xbf16> to vector<256x256xbf16>
    %cst_40 = arith.constant dense<0.000000e+00> : vector<48x256xf32>
    %58 = tpu.matmul %55, %57, %cst_40 {dimension_numbers = #tpu.dot_dimension_numbers<[1], [0], [0], [1], [0, 0, 1, 1], [], []>} : vector<48x256xbf16>, vector<256x256xbf16>, vector<48x256xf32> -> vector<48x256xf32>
    %59 = arith.addf %53, %58 : vector<48x256xf32>
    %c1_i32_41 = arith.constant 1 : i32
    %60 = tpu.dynamic_rotate %49 by %c1_i32_41 dim 0 : vector<48x256xf32>, i32 -> vector<48x256xf32>
    %61 = arith.truncf %60 : vector<48x256xf32> to vector<48x256xbf16>
    %c0_42 = arith.constant 0 : index
    %c0_43 = arith.constant 0 : index
    %c0_44 = arith.constant 0 : index
    %62 = vector.load %arg2[%c0_42, %c0_43, %c0_44] : memref<3x256x256xbf16, #tpu.memory_space<vmem>>, vector<1x256x256xbf16>
    %63 = vector.shape_cast %62 : vector<1x256x256xbf16> to vector<256x256xbf16>
    %cst_45 = arith.constant dense<0.000000e+00> : vector<48x256xf32>
    %64 = tpu.matmul %61, %63, %cst_45 {dimension_numbers = #tpu.dot_dimension_numbers<[1], [0], [0], [1], [0, 0, 1, 1], [], []>} : vector<48x256xbf16>, vector<256x256xbf16>, vector<48x256xf32> -> vector<48x256xf32>
    %65 = arith.addf %59, %64 : vector<48x256xf32>
    %c0_46 = arith.constant 0 : index
    %c0_47 = arith.constant 0 : index
    %66 = vector.load %arg10[%c0_46, %c0_47] : memref<1x8xf32, #tpu.memory_space<vmem>>, vector<1x8xf32>
    %c0_48 = arith.constant 0 : index
    %c0_49 = arith.constant 0 : index
    %67 = vector.load %arg11[%c0_48, %c0_49] : memref<1x8xf32, #tpu.memory_space<vmem>>, vector<1x8xf32>
    %cst_50 = arith.constant dense<0.000000e+00> : vector<1x256xf32>
    %68 = tpu.matmul %3, %65, %cst_50 {dimension_numbers = #tpu.dot_dimension_numbers<[1], [0], [0], [1], [0, 0, 1, 1], [], []>} : vector<1x48xf32>, vector<48x256xf32>, vector<1x256xf32> -> vector<1x256xf32>
    %69 = arith.mulf %65, %65 : vector<48x256xf32>
    %cst_51 = arith.constant dense<0.000000e+00> : vector<1x256xf32>
    %70 = tpu.matmul %3, %69, %cst_51 {dimension_numbers = #tpu.dot_dimension_numbers<[1], [0], [0], [1], [0, 0, 1, 1], [], []>} : vector<1x48xf32>, vector<48x256xf32>, vector<1x256xf32> -> vector<1x256xf32>
    %cst_52 = arith.constant dense<0.000000e+00> : vector<1x8xf32>
    %71 = tpu.matmul %68, %1, %cst_52 {dimension_numbers = #tpu.dot_dimension_numbers<[1], [0], [0], [1], [0, 0, 1, 1], [], []>} : vector<1x256xf32>, vector<256x8xf32>, vector<1x8xf32> -> vector<1x8xf32>
    %cst_53 = arith.constant 0.001953125 : f32
    %72 = vector.broadcast %cst_53 : f32 to vector<1x8xf32>
    %73 = arith.mulf %71, %72 : vector<1x8xf32>
    %cst_54 = arith.constant dense<0.000000e+00> : vector<1x8xf32>
    %74 = tpu.matmul %70, %1, %cst_54 {dimension_numbers = #tpu.dot_dimension_numbers<[1], [0], [0], [1], [0, 0, 1, 1], [], []>} : vector<1x256xf32>, vector<256x8xf32>, vector<1x8xf32> -> vector<1x8xf32>
    %cst_55 = arith.constant 0.001953125 : f32
    %75 = vector.broadcast %cst_55 : f32 to vector<1x8xf32>
    %76 = arith.mulf %74, %75 : vector<1x8xf32>
    %77 = arith.mulf %73, %73 : vector<1x8xf32>
    %78 = arith.subf %76, %77 : vector<1x8xf32>
    %cst_56 = arith.constant 9.99999974E-6 : f32
    %79 = vector.broadcast %cst_56 : f32 to vector<1x8xf32>
    %80 = arith.addf %78, %79 : vector<1x8xf32>
    %81 = math.rsqrt %80 : vector<1x8xf32>
    %82 = arith.mulf %66, %81 : vector<1x8xf32>
    %83 = arith.mulf %82, %73 : vector<1x8xf32>
    %84 = arith.subf %67, %83 : vector<1x8xf32>
    %cst_57 = arith.constant dense<0.000000e+00> : vector<1x256xf32>
    %85 = tpu.matmul %82, %2, %cst_57 {dimension_numbers = #tpu.dot_dimension_numbers<[1], [0], [0], [1], [0, 0, 1, 1], [], []>} : vector<1x8xf32>, vector<8x256xf32>, vector<1x256xf32> -> vector<1x256xf32>
    %cst_58 = arith.constant dense<0.000000e+00> : vector<1x256xf32>
    %86 = tpu.matmul %84, %2, %cst_58 {dimension_numbers = #tpu.dot_dimension_numbers<[1], [0], [0], [1], [0, 0, 1, 1], [], []>} : vector<1x8xf32>, vector<8x256xf32>, vector<1x256xf32> -> vector<1x256xf32>
    %87 = vector.broadcast %85 : vector<1x256xf32> to vector<48x256xf32>
    %88 = arith.mulf %65, %87 : vector<48x256xf32>
    %89 = vector.broadcast %86 : vector<1x256xf32> to vector<48x256xf32>
    %90 = arith.addf %88, %89 : vector<48x256xf32>
    %91 = arith.truncf %0 : vector<48x128xf32> to vector<48x128xbf16>
    %c0_59 = arith.constant 0 : index
    %c0_60 = arith.constant 0 : index
    %92 = vector.load %arg3[%c0_59, %c0_60] : memref<128x256xbf16, #tpu.memory_space<vmem>>, vector<128x256xbf16>
    %cst_61 = arith.constant dense<0.000000e+00> : vector<48x256xf32>
    %93 = tpu.matmul %91, %92, %cst_61 {dimension_numbers = #tpu.dot_dimension_numbers<[1], [0], [0], [1], [0, 0, 1, 1], [], []>} : vector<48x128xbf16>, vector<128x256xbf16>, vector<48x256xf32> -> vector<48x256xf32>
    %c0_62 = arith.constant 0 : index
    %c0_63 = arith.constant 0 : index
    %94 = vector.load %arg12[%c0_62, %c0_63] : memref<1x8xf32, #tpu.memory_space<vmem>>, vector<1x8xf32>
    %c0_64 = arith.constant 0 : index
    %c0_65 = arith.constant 0 : index
    %95 = vector.load %arg13[%c0_64, %c0_65] : memref<1x8xf32, #tpu.memory_space<vmem>>, vector<1x8xf32>
    %cst_66 = arith.constant dense<0.000000e+00> : vector<1x256xf32>
    %96 = tpu.matmul %3, %93, %cst_66 {dimension_numbers = #tpu.dot_dimension_numbers<[1], [0], [0], [1], [0, 0, 1, 1], [], []>} : vector<1x48xf32>, vector<48x256xf32>, vector<1x256xf32> -> vector<1x256xf32>
    %97 = arith.mulf %93, %93 : vector<48x256xf32>
    %cst_67 = arith.constant dense<0.000000e+00> : vector<1x256xf32>
    %98 = tpu.matmul %3, %97, %cst_67 {dimension_numbers = #tpu.dot_dimension_numbers<[1], [0], [0], [1], [0, 0, 1, 1], [], []>} : vector<1x48xf32>, vector<48x256xf32>, vector<1x256xf32> -> vector<1x256xf32>
    %cst_68 = arith.constant dense<0.000000e+00> : vector<1x8xf32>
    %99 = tpu.matmul %96, %1, %cst_68 {dimension_numbers = #tpu.dot_dimension_numbers<[1], [0], [0], [1], [0, 0, 1, 1], [], []>} : vector<1x256xf32>, vector<256x8xf32>, vector<1x8xf32> -> vector<1x8xf32>
    %cst_69 = arith.constant 0.001953125 : f32
    %100 = vector.broadcast %cst_69 : f32 to vector<1x8xf32>
    %101 = arith.mulf %99, %100 : vector<1x8xf32>
    %cst_70 = arith.constant dense<0.000000e+00> : vector<1x8xf32>
    %102 = tpu.matmul %98, %1, %cst_70 {dimension_numbers = #tpu.dot_dimension_numbers<[1], [0], [0], [1], [0, 0, 1, 1], [], []>} : vector<1x256xf32>, vector<256x8xf32>, vector<1x8xf32> -> vector<1x8xf32>
    %cst_71 = arith.constant 0.001953125 : f32
    %103 = vector.broadcast %cst_71 : f32 to vector<1x8xf32>
    %104 = arith.mulf %102, %103 : vector<1x8xf32>
    %105 = arith.mulf %101, %101 : vector<1x8xf32>
    %106 = arith.subf %104, %105 : vector<1x8xf32>
    %cst_72 = arith.constant 9.99999974E-6 : f32
    %107 = vector.broadcast %cst_72 : f32 to vector<1x8xf32>
    %108 = arith.addf %106, %107 : vector<1x8xf32>
    %109 = math.rsqrt %108 : vector<1x8xf32>
    %110 = arith.mulf %94, %109 : vector<1x8xf32>
    %111 = arith.mulf %110, %101 : vector<1x8xf32>
    %112 = arith.subf %95, %111 : vector<1x8xf32>
    %cst_73 = arith.constant dense<0.000000e+00> : vector<1x256xf32>
    %113 = tpu.matmul %110, %2, %cst_73 {dimension_numbers = #tpu.dot_dimension_numbers<[1], [0], [0], [1], [0, 0, 1, 1], [], []>} : vector<1x8xf32>, vector<8x256xf32>, vector<1x256xf32> -> vector<1x256xf32>
    %cst_74 = arith.constant dense<0.000000e+00> : vector<1x256xf32>
    %114 = tpu.matmul %112, %2, %cst_74 {dimension_numbers = #tpu.dot_dimension_numbers<[1], [0], [0], [1], [0, 0, 1, 1], [], []>} : vector<1x8xf32>, vector<8x256xf32>, vector<1x256xf32> -> vector<1x256xf32>
    %115 = vector.broadcast %113 : vector<1x256xf32> to vector<48x256xf32>
    %116 = arith.mulf %93, %115 : vector<48x256xf32>
    %117 = vector.broadcast %114 : vector<1x256xf32> to vector<48x256xf32>
    %118 = arith.addf %116, %117 : vector<48x256xf32>
    %119 = arith.addf %90, %118 : vector<48x256xf32>
    %cst_75 = arith.constant 0.000000e+00 : f32
    %120 = vector.broadcast %cst_75 : f32 to vector<48x256xf32>
    %121 = arith.maximumf %119, %120 : vector<48x256xf32>
    %c0_76 = arith.constant 0 : index
    %c0_77 = arith.constant 0 : index
    %122 = vector.load %arg14[%c0_76, %c0_77] : memref<48x256xf32, #tpu.memory_space<vmem>>, vector<48x256xf32>
    tpu.vector_store %arg14[%c0_76, %c0_77], %121 {strides = array<i32>} : memref<48x256xf32, #tpu.memory_space<vmem>>, vector<48x256xf32>,
    return
  }
}

</mosaic_0001>

<bundles_post_ra>
// kernel: tpu_custom_call.1
= control target key start
LH: loop header
LB: loop body
LE: loop exit
PB: predicated region body
PF: predicated region fallthrough
CT: control target
= control target key end

     0   :  { %19 = vsyncpa [#allocation3], 0  ;;  %s5363_s0 = inlined_call_operand.vmem [shape: f32[48,128], index: 0, kind: input, shape index: {}]   ;;  %s5364_s1 = inlined_call_operand.hbm [shape: bf16[3,128,256], index: 1, kind: input, shape index: {}]   ;;  %s5365_s2 = inlined_call_operand.hbm [shape: bf16[3,256,256], index: 2, kind: input, shape index: {}]   ;;  %s5366_s3 = inlined_call_operand.vmem [shape: bf16[128,256], index: 3, kind: input, shape index: {}]   ;;  %s5367_s4 = inlined_call_operand.vmem [shape: f32[256,8], index: 4, kind: input, shape index: {}]   ;;  %s5368_s5 = inlined_call_operand.vmem [shape: f32[8,256], index: 5, kind: input, shape index: {}]   ;;  %s5369_s6 = inlined_call_operand.vmem [shape: f32[1,48], index: 6, kind: input, shape index: {}]   ;;  %s5370_s7 = inlined_call_operand.vmem [shape: f32[48,1], index: 7, kind: input, shape index: {}]   ;;  %s5371_s8 = inlined_call_operand.vmem [shape: f32[1,8], index: 8, kind: input, shape index: {}]   ;;  %s5372_s9 = inlined_call_operand.vmem [shape: f32[1,8], index: 9, kind: input, shape index: {}]   ;;  %s5373_s10 = inlined_call_operand.vmem [shape: f32[1,8], index: 10, kind: input, shape index: {}]   ;;  %s5374_s11 = inlined_call_operand.vmem [shape: f32[1,8], index: 11, kind: input, shape index: {}]   ;;  %s5375_s12 = inlined_call_operand.vmem [shape: f32[1,8], index: 12, kind: input, shape index: {}]   ;;  %s5376_s13 = inlined_call_operand.vmem [shape: f32[1,8], index: 13, kind: input, shape index: {}]   ;;  %s5377_s14 = inlined_call_operand.hbm [shape: f32[48,256], index: 14, kind: output, shape index: {}]  }
   0x1   :  { %20 = vsyncpa [#allocation6], 0 }
   0x2   :  { %21 = vsyncpa [#allocation4], 0  ;;  %s4274_s29 = smov [#allocation2]   ;;  %s4202_s17 = scalar_lea.hbm %s5364_s1, 6144 }
   0x3   :  { %s29_s30 = sshll.u32 %s4274_s29, 4  ;;  %p4203_p0 = scmp.ne.s32.totalorder %s5364_s1, %s4202_s17  ;;  %s30_s30 = int_to_ptr.vmem [resolvable:$true] %s29_s30 }
   0x4   :  { %p4206_p1 = scmp.lt.u32.totalorder %s4202_s17, %s5364_s1 }
   0x6   :  { %p4208_p2 = pnand %p4206_p1, %p4203_p0 }
   0x8   :  { %4211 = shalt.err (!%p4208_p2)
}
   0x9   :  { %s4212_s22 = scalar_lea.vmem %s30_s30, 6144  ;;  %p4217_p4 = scmp.lt.s32.totalorder %s30_s30, %s30_s30 }
   0xa   :  { %p4213_p3 = scmp.ne.s32.totalorder %s30_s30, %s4212_s22  ;;  %p4218_p5 = scmp.lt.s32.totalorder %s4212_s22, %s4212_s22 }
   0xc   :  { %p4219_p6 = por %p4218_p5, %p4217_p4 }
   0xe   :  { %p4220_p7 = pnand %p4219_p6, %p4213_p3 }
  0x10   :  { %4223 = shalt.err (!%p4220_p7)
}
  0x11   :  { %s4275_s23 = smov 128   ;;  %s4276_s24 = smov 8  }
  0x12   :  { %35 = dma.hbm_to_vmem [thread:$0]  %s5364_s1, 6144, %s30_s30, [#allocation3], %s4275_s23, %s4275_s23, %s4276_s24  }
  0x13   :  { %s4277_s27 = smov [#allocation5]   ;;  %s4224_s16 = scalar_lea.hbm %s5365_s2, 12288 }
  0x14   :  { %s41_s28 = sshll.u32 %s4277_s27, 4  ;;  %p4225_p8 = scmp.ne.s32.totalorder %s5365_s2, %s4224_s16  ;;  %s42_s28 = int_to_ptr.vmem [resolvable:$true] %s41_s28 }
  0x15   :  { %p4228_p9 = scmp.lt.u32.totalorder %s4224_s16, %s5365_s2 }
  0x17   :  { %p4230_p10 = pnand %p4228_p9, %p4225_p8 }
  0x19   :  { %4233 = shalt.err (!%p4230_p10)
}
  0x1a   :  { %s4234_s21 = scalar_lea.vmem %s42_s28, 12288  ;;  %p4239_p12 = scmp.lt.s32.totalorder %s42_s28, %s42_s28 }
  0x1b   :  { %p4235_p11 = scmp.ne.s32.totalorder %s42_s28, %s4234_s21  ;;  %p4240_p13 = scmp.lt.s32.totalorder %s4234_s21, %s4234_s21 }
  0x1d   :  { %p4241_p0 = por %p4240_p13, %p4239_p12 }
  0x1f   :  { %p4242_p1 = pnand %p4241_p0, %p4235_p11 }
  0x21   :  { %4245 = shalt.err (!%p4242_p1)
}
  0x22   :  { %47 = dma.hbm_to_vmem [thread:$0]  %s5365_s2, 12288, %s42_s28, [#allocation6], %s4275_s23, %s4275_s23, %s4276_s24  }
  0x23   :  { %4268 = dma.done.wait [#allocation3], 6144  }
  0x24   :  { %4269 = vsyncadd [#allocation3], 4294961152 }
  0x25   :  { %4270 = dma.done.wait [#allocation6], 12288  }
  0x26   :  { %4271 = vsyncadd [#allocation6], 4294955008  ;;  %v5378_v0 = vmov 0   ;;  %v3953_v1 = vld [vmem:[#allocation2 + $0x104] ss:$8 sps:$4 sm:$0xff]   ;;  %v150_v7 = vlaneseq  ;;  %v4402_v15 = vld [vmem:[%s5363_s0 + $0x10] sm:$0xff] }
  0x27   :  { %291 = vmatprep.mubr.bf16.mxu0 %v5378_v0  ;;  %3951 = vset.pattern.permute.xlu0 %v5378_v0  ;;  %v3955_v2 = vld [vmem:[#allocation2 + $0x100] ss:$8 sps:$4 sm:$0xff]   ;;  %v3956_v3 = vld [vmem:[#allocation2 + $0x114] ss:$8 sps:$4 sm:$0xff]   ;;  %v3958_v4 = vld [vmem:[#allocation2 + $0x110] ss:$8 sps:$4 sm:$0xff]  }
  0x28   :  { %3952 = vset.pattern.permute.xlu1 %v5378_v0  ;;  %259 = vmatprep.subr.bf16.mxu0 %v3953_v1  ;;  %v3959_v5 = vld [vmem:[#allocation2 + $0x124] ss:$8 sps:$4 sm:$0xff]   ;;  %v3961_v6 = vld [vmem:[#allocation2 + $0x120] ss:$8 sps:$4 sm:$0xff]   ;;  %v3962_v8 = vld [vmem:[#allocation2 + $0x134] ss:$8 sps:$4 sm:$0xff]  }
  0x29   :  { %260 = vmatpush1.bf16.msra.mxu0 %v3955_v2  ;;  %v3964_v9 = vld [vmem:[#allocation2 + $0x130] ss:$8 sps:$4 sm:$0xff]   ;;  %v4385_v10 = vshrl.u32 %v150_v7, 7  ;;  %v3965_v11 = vld [vmem:[#allocation2 + $0x144] ss:$8 sps:$4 sm:$0xff]   ;;  %v467_v18 = vrot.slane %v4402_v15, 7 }
  0x2a   :  { %261 = vmatprep.subr.bf16.mxu0 %v3956_v3  ;;  %v4390_v12 = vld [vmem:[%s5363_s0] sm:$0xff]  ;;  %v4395_v13 = vld [vmem:[%s5363_s0 + $0x8] sm:$0xff]  ;;  %v3968_v19 = vld [vmem:[#allocation2 + $0x154] ss:$8 sps:$4 sm:$0xff]   ;;  %v146_v34 = vrot.slane %v4402_v15, 1  ;;  %vm654_vm2 = vcmask 392192  }
  0x2b   :  { %v465_v14 = vrot.slane %v4390_v12, 7  ;;  %vm471_vm0 = vcmp.lt.s32.totalorder %v4385_v10, 1  ;;  %v466_v16 = vrot.slane %v4395_v13, 7  ;;  %v3967_v17 = vld [vmem:[#allocation2 + $0x140] ss:$8 sps:$4 sm:$0xff]   ;;  %v4417_v22 = vld [vmem:[%s5363_s0 + $0x18] sm:$0xff] }
  0x2c   :  { %v3970_v23 = vld [vmem:[#allocation2 + $0x150] ss:$8 sps:$4 sm:$0xff]   ;;  %v468_v24 = vrot.slane %v4417_v22, 7  ;;  %v3971_v25 = vld [vmem:[#allocation2 + $0x164] ss:$8 sps:$4 sm:$0xff]   ;;  %v144_v32 = vrot.slane %v4390_v12, 1 }
  0x2d   :  { %262 = vmatpush1.bf16.msra.mxu0 %v3958_v4  ;;  %v4408_v20 = vsel %vm471_vm0, %v465_v14, %v466_v16  ;;  %v4412_v21 = vsel %vm471_vm0, %v466_v16, %v467_v18  ;;  %v4423_v26 = vld [vmem:[%s5363_s0 + $0x20] sm:$0xff]  ;;  %v4433_v29 = vld [vmem:[%s5363_s0 + $0x28] sm:$0xff]  ;;  %v145_v33 = vrot.slane %v4395_v13, 1  ;;  %v3974_v36 = vld [vmem:[#allocation2 + $0x174] ss:$8 sps:$4 sm:$0xff]   ;;  %vm152_vm1 = vcmp.lt.s32.totalorder %v4385_v10, 7 }
  0x2e   :  { %263 = vmatprep.subr.bf16.mxu0 %v3959_v5  ;;  %v4427_v27 = vsel %vm471_vm0, %v467_v18, %v468_v24  ;;  %v469_v28 = vrot.slane %v4423_v26, 7  ;;  %v3973_v31 = vld [vmem:[#allocation2 + $0x160] ss:$8 sps:$4 sm:$0xff]   ;;  %v470_v35 = vrot.slane %v4433_v29, 7  ;;  %v3976_v42 = vld [vmem:[#allocation2 + $0x170] ss:$8 sps:$4 sm:$0xff]  }
  0x2f   :  { %v479_v30 = vpack.c.bf16 %v4427_v27, %v4412_v21  ;;  %v156_v43 = vsel %vm152_vm1, %v145_v33, %v146_v34  ;;  %v157_v44 = vsel %vm152_vm1, %v144_v32, %v145_v33  ;;  %v3979_v45 = vld [vmem:[#allocation2 + $0x84] ss:$8 sps:$4 sm:$0xff]   ;;  %v3977_v47 = vld [vmem:[#allocation2 + $0x80] ss:$8 sps:$4 sm:$0xff]   ;;  %v147_v48 = vrot.slane %v4417_v22, 1 }
  0x30   :  { %v4444_v37 = vsel %vm471_vm0, %v468_v24, %v469_v28  ;;  %v4448_v38 = vsel %vm471_vm0, %v470_v35, %v465_v14  ;;  %v4452_v39 = vsel %vm471_vm0, %v469_v28, %v470_v35  ;;  %v159_v46 = vpack.c.bf16 %v156_v43, %v157_v44  ;;  %v3982_v50 = vld [vmem:[#allocation2 + $0x94] ss:$8 sps:$4 sm:$0xff]   ;;  %v3980_v51 = vld [vmem:[#allocation2 + $0x90] ss:$8 sps:$4 sm:$0xff]   ;;  %v3985_v52 = vld [vmem:[#allocation2 + $0xa4] ss:$8 sps:$4 sm:$0xff]  }
  0x31   :  { %264 = vmatpush1.bf16.msra.mxu0 %v3961_v6  ;;  %v478_v40 = vpack.c.bf16 %v4408_v20, %v4448_v38  ;;  %v480_v41 = vpack.c.bf16 %v4452_v39, %v4444_v37  ;;  %v148_v49 = vrot.slane %v4423_v26, 1  ;;  %v155_v54 = vsel %vm152_vm1, %v146_v34, %v147_v48  ;;  %v3983_v55 = vld [vmem:[#allocation2 + $0xa0] ss:$8 sps:$4 sm:$0xff]   ;;  %v3988_v56 = vld [vmem:[#allocation2 + $0xb4] ss:$8 sps:$4 sm:$0xff]  }
  0x32   :  { %265 = vmatprep.subr.bf16.mxu0 %v3962_v8  ;;  %v149_v58 = vrot.slane %v4433_v29, 1  ;;  %v3986_v59 = vld [vmem:[#allocation2 + $0xb0] ss:$8 sps:$4 sm:$0xff]   ;;  %v3991_v60 = vld [vmem:[#allocation2 + $0xc4] ss:$8 sps:$4 sm:$0xff]   ;;  %v4490_v24 = vpack.c.bf16 %v4433_v29, %v4423_v26  ;;  %v5380_v26 = vmov 0.0  }
  0x33   :  { %v154_v53 = vsel %vm152_vm1, %v147_v48, %v148_v49  ;;  %v3989_v63 = vld [vmem:[#allocation2 + $0xc0] ss:$8 sps:$4 sm:$0xff]   ;;  %v3994_v1 = vld [vmem:[#allocation2 + $0xd4] ss:$8 sps:$4 sm:$0xff]   ;;  %v3992_v3 = vld [vmem:[#allocation2 + $0xd0] ss:$8 sps:$4 sm:$0xff]   ;;  %722 = vmatprep.mubr.f32.mxu1 %v5380_v26 }
  0x34   :  { %v160_v57 = vpack.c.bf16 %v154_v53, %v155_v54  ;;  %v153_v61 = vsel %vm152_vm1, %v148_v49, %v149_v58  ;;  %v158_v62 = vsel %vm152_vm1, %v149_v58, %v144_v32  ;;  %v3997_v4 = vld [vmem:[#allocation2 + $0xe4] ss:$8 sps:$4 sm:$0xff]   ;;  %v3995_v5 = vld [vmem:[#allocation2 + $0xe0] ss:$8 sps:$4 sm:$0xff]   ;;  %v4000_v6 = vld [vmem:[#allocation2 + $0xf4] ss:$8 sps:$4 sm:$0xff]  }
  0x35   :  { %266 = vmatpush1.bf16.msra.mxu0 %v3964_v9  ;;  %v161_v2 = vpack.c.bf16 %v158_v62, %v153_v61  ;;  %v3998_v7 = vld [vmem:[#allocation2 + $0xf0] ss:$8 sps:$4 sm:$0xff]   ;;  %v4003_v8 = vld [vmem:[#allocation2 + $0x4] ss:$8 sps:$4 sm:$0xff]   ;;  %v4001_v9 = vld [vmem:[#allocation2] ss:$8 sps:$4 sm:$0xff]  }
  0x36   :  { %267 = vmatprep.subr.bf16.mxu0 %v3965_v11  ;;  %v4478_v11 = vpack.c.bf16 %v4395_v13, %v4390_v12  ;;  %v4006_v14 = vld [vmem:[#allocation2 + $0x14] ss:$8 sps:$4 sm:$0xff]   ;;  %v4004_v16 = vld [vmem:[#allocation2 + $0x10] ss:$8 sps:$4 sm:$0xff]   ;;  %v4007_v18 = vld [vmem:[#allocation2 + $0x20] ss:$8 sps:$4 sm:$0xff]  }
  0x37   :  { %v4012_v12 = vld [vmem:[#allocation2 + $0x34] ss:$8 sps:$4 sm:$0xff]   ;;  %v4010_v13 = vld [vmem:[#allocation2 + $0x30] ss:$8 sps:$4 sm:$0xff]   ;;  %v4021_v28 = vld [vmem:[#allocation2 + $0x64] ss:$8 sps:$4 sm:$0xff]  }
  0x38   :  { %v4024_v32 = vld [vmem:[#allocation2 + $0x74] ss:$8 sps:$4 sm:$0xff]   ;;  %v4022_v33 = vld [vmem:[#allocation2 + $0x70] ss:$8 sps:$4 sm:$0xff]   ;;  %vm961_vm3 = vcmask 64512  }
  0x39   :  { %268 = vmatpush1.bf16.msra.mxu0 %v3967_v17  ;;  %v4009_v17 = vld [vmem:[#allocation2 + $0x24] ss:$8 sps:$4 sm:$0xff]  }
  0x3a   :  { %269 = vmatprep.subr.bf16.mxu0 %v3968_v19  ;;  %v4484_v19 = vpack.c.bf16 %v4417_v22, %v4402_v15  ;;  %v4018_v15 = vld [vmem:[#allocation2 + $0x54] ss:$8 sps:$4 sm:$0xff]   ;;  %v4016_v22 = vld [vmem:[#allocation2 + $0x50] ss:$8 sps:$4 sm:$0xff]  }
  0x3d   :  { %270 = vmatpush1.bf16.msra.mxu0 %v3970_v23  ;;  %v4015_v23 = vld [vmem:[#allocation2 + $0x44] ss:$8 sps:$4 sm:$0xff]  }
  0x3e   :  { %271 = vmatprep.subr.bf16.mxu0 %v3971_v25  ;;  %v4013_v25 = vld [vmem:[#allocation2 + $0x40] ss:$8 sps:$4 sm:$0xff]  }
  0x41   :  { %272 = vmatpush1.bf16.msra.mxu0 %v3973_v31  ;;  %v4019_v31 = vld [vmem:[#allocation2 + $0x60] ss:$8 sps:$4 sm:$0xff]  }
  0x42   :  { %273 = vmatprep.subr.bf16.mxu0 %v3974_v36 }
  0x45   :  { %274 = vmatpush1.bf16.msra.mxu0 %v3976_v42 }
  0x46   :  { %402 = vmatprep.subr.bf16.mxu0 %v3979_v45 }
  0x48   :  { %292 = vmatmul.mubr.bf16.vlgmr.msra.gmra.mrb[0].mxu0 %v159_v46 }
  0x49   :  { %403 = vmatpush1.bf16.msra.mxu0 %v3977_v47  ;;  %301 = vmatprep.mubr.bf16.mxu0 %v5378_v0 }
  0x4a   :  { %404 = vmatprep.subr.bf16.mxu0 %v3982_v50 }
  0x4d   :  { %405 = vmatpush1.bf16.msra.mxu0 %v3980_v51 }
  0x4e   :  { %406 = vmatprep.subr.bf16.mxu0 %v3985_v52 }
  0x50   :  { %302 = vmatmul.mubr.bf16.gmra.mrb[4].mxu0 %v160_v57 }
  0x51   :  { %407 = vmatpush1.bf16.msra.mxu0 %v3983_v55  ;;  %311 = vmatprep.mubr.bf16.mxu0 %v5378_v0 }
  0x52   :  { %408 = vmatprep.subr.bf16.mxu0 %v3988_v56 }
  0x55   :  { %409 = vmatpush1.bf16.msra.mxu0 %v3986_v59 }
  0x56   :  { %410 = vmatprep.subr.bf16.mxu0 %v3991_v60 }
  0x58   :  { %312 = vmatmul.mubr.bf16.gmra.mrb[8].mxu0 %v161_v2  ;;  %v117_v2 = vld [vmem:[%s5369_s6] sm:$0x1] }
  0x59   :  { %411 = vmatpush1.bf16.msra.mxu0 %v3989_v63  ;;  %434 = vmatprep.mubr.bf16.mxu0 %v5378_v0 }
  0x5a   :  { %412 = vmatprep.subr.bf16.mxu0 %v3994_v1 }
  0x5d   :  { %413 = vmatpush1.bf16.msra.mxu0 %v3992_v3  ;;  %v99_v3 = vld [vmem:[%s5367_s4 + $0x80] sm:$0xff] }
  0x5e   :  { %414 = vmatprep.subr.bf16.mxu0 %v3997_v4  ;;  %v100_v4 = vld [vmem:[%s5367_s4 + $0x88] sm:$0xff] }
  0x61   :  { %415 = vmatpush1.bf16.msra.mxu0 %v3995_v5  ;;  %v4577_v5 = vpack.c.bf16 %v100_v4, %v99_v3  ;;  %v98_v3 = vld [vmem:[%s5367_s4 + $0x78] sm:$0xff] }
  0x62   :  { %416 = vmatprep.subr.bf16.mxu0 %v4000_v6  ;;  %v83_v6 = vld [vmem:[%s5367_s4] sm:$0xff] }
  0x65   :  { %417 = vmatpush1.bf16.msra.mxu0 %v3998_v7  ;;  %v84_v7 = vld [vmem:[%s5367_s4 + $0x8] sm:$0xff] }
  0x66   :  { %577 = vmatprep.subr.bf16.mxu0 %v4003_v8  ;;  %v101_v8 = vld [vmem:[%s5367_s4 + $0x90] sm:$0xff] }
  0x68   :  { %435 = vmatmul.mubr.bf16.vlgmr.msra.gmra.mrb[0].mxu0 %v4478_v11 }
  0x69   :  { %578 = vmatpush1.bf16.msra.mxu0 %v4001_v9  ;;  %444 = vmatprep.mubr.bf16.mxu0 %v5378_v0  ;;  %v102_v9 = vld [vmem:[%s5367_s4 + $0x98] sm:$0xff] }
  0x6a   :  { %579 = vmatprep.subr.bf16.mxu0 %v4006_v14  ;;  %v4591_v14 = vpack.c.bf16 %v84_v7, %v83_v6 }
  0x6d   :  { %580 = vmatpush1.bf16.msra.mxu0 %v4004_v16  ;;  %v4594_v16 = vpack.c.bf16 %v102_v9, %v101_v8 }
  0x6e   :  { %581 = vmatprep.subr.bf16.mxu0 %v4009_v17  ;;  %v85_v17 = vld [vmem:[%s5367_s4 + $0x10] sm:$0xff] }
  0x70   :  { %445 = vmatmul.mubr.bf16.gmra.mrb[4].mxu0 %v4484_v19 }
  0x71   :  { %582 = vmatpush1.bf16.msra.mxu0 %v4007_v18  ;;  %454 = vmatprep.mubr.bf16.mxu0 %v5378_v0  ;;  %v86_v18 = vld [vmem:[%s5367_s4 + $0x18] sm:$0xff] }
  0x72   :  { %583 = vmatprep.subr.bf16.mxu0 %v4012_v12  ;;  %v103_v12 = vld [vmem:[%s5367_s4 + $0xa0] sm:$0xff] }
  0x75   :  { %584 = vmatpush1.bf16.msra.mxu0 %v4010_v13  ;;  %v104_v13 = vld [vmem:[%s5367_s4 + $0xa8] sm:$0xff] }
  0x76   :  { %585 = vmatprep.subr.bf16.mxu0 %v4015_v23  ;;  %v4610_v23 = vpack.c.bf16 %v86_v18, %v85_v17  ;;  %v4736_v17 = vld [vmem:[%s5368_s5 + $0x8] sm:$0xff]  ;;  %v4741_v18 = vld [vmem:[%s5368_s5] sm:$0xff] }
  0x78   :  { %455 = vmatmul.mubr.bf16.gmra.mrb[8].mxu0 %v4490_v24 }
  0x79   :  { %586 = vmatpush1.bf16.msra.mxu0 %v4013_v25  ;;  %609 = vmatprep.mubr.bf16.mxu0 %v5378_v0  ;;  %v4613_v25 = vpack.c.bf16 %v104_v13, %v103_v12  ;;  %v118_v12 = vld [vmem:[%s5370_s7] sm:$0xff]  ;;  %v120_v13 = vld [vmem:[%s5370_s7 + $0x10] sm:$0xff] }
  0x7a   :  { %587 = vmatprep.subr.bf16.mxu0 %v4018_v15  ;;  %v87_v15 = vld [vmem:[%s5367_s4 + $0x20] sm:$0xff]  ;;  %1164 = vperm.xlu0 %3951, %v118_v12   ;;  %v4060_v12 = vld [vmem:[#allocation5 + $0x2b4] ss:$8 sps:$4 sm:$0xff]  }
  0x7b   :  { %1174 = vperm.xlu1 %3952, %v120_v13   ;;  %v4058_v13 = vld [vmem:[#allocation5 + $0x2b0] ss:$8 sps:$4 sm:$0xff]  }
  0x7d   :  { %588 = vmatpush1.bf16.msra.mxu0 %v4016_v22  ;;  %v88_v22 = vld [vmem:[%s5367_s4 + $0x28] sm:$0xff] }
  0x7e   :  { %589 = vmatprep.subr.bf16.mxu0 %v4021_v28  ;;  %v105_v28 = vld [vmem:[%s5367_s4 + $0xb0] sm:$0xff] }
  0x81   :  { %590 = vmatpush1.bf16.msra.mxu0 %v4019_v31  ;;  %v106_v31 = vld [vmem:[%s5367_s4 + $0xb8] sm:$0xff] }
  0x82   :  { %591 = vmatprep.subr.bf16.mxu0 %v4024_v32  ;;  %v4628_v32 = vpack.c.bf16 %v88_v22, %v87_v15  ;;  %v119_v15 = vld [vmem:[%s5370_s7 + $0x8] sm:$0xff]  ;;  %v121_v22 = vld [vmem:[%s5370_s7 + $0x18] sm:$0xff] }
  0x83   :  { %1169 = vperm.xlu0 %3951, %v119_v15   ;;  %1179 = vperm.xlu1 %3952, %v121_v22  }
  0x85   :  { %592 = vmatpush1.bf16.msra.mxu0 %v4022_v33  ;;  %v4631_v33 = vpack.c.bf16 %v106_v31, %v105_v28  ;;  %v4025_v28 = vld [vmem:[#allocation5 + $0x200] ss:$8 sps:$4 sm:$0xff]   ;;  %v4027_v31 = vld [vmem:[#allocation5 + $0x204] ss:$8 sps:$4 sm:$0xff]  }
  0x86   :  { %1466 = vmatprep.subr.bf16.mxu0 %v4027_v31 }
  0x88   :  { %610 = vmatmul.mubr.bf16.vlgmr.msra.gmra.mrb[0].mxu0 %v478_v40 }
  0x89   :  { %619 = vmatprep.mubr.bf16.mxu0 %v5378_v0  ;;  %1467 = vmatpush1.bf16.msra.mxu0 %v4025_v28 }
  0x90   :  { %620 = vmatmul.mubr.bf16.gmra.mrb[4].mxu0 %v479_v30 }
  0x91   :  { %629 = vmatprep.mubr.bf16.mxu0 %v5378_v0 }
  0x98   :  { %630 = vmatmul.mubr.bf16.gmra.mrb[8].mxu0 %v480_v41 }
 0x15b   :  { %v4506_v29 = vpop.f32.mrb[0].mxu0 }
 0x15c   :  { %v4508_v34 = vpop.f32.mrb[1].mxu0  ;;  %v729_v35 = vmul.f32 %v4506_v29, %v4506_v29 }
 0x15d   :  { %v4510_v20 = vpop.f32.mrb[2].mxu0  ;;  %v730_v36 = vmul.f32 %v4508_v34, %v4508_v34 }
 0x15e   :  { %v731_v21 = vmul.f32 %v4510_v20, %v4510_v20  ;;  %v4516_v27 = vpop.f32.mrb[3].mxu0  ;;  %v3632_v30 = vpack.c.bf16 %v4510_v20, %v4506_v29 }
 0x15f   :  { %v732_v37 = vmul.f32 %v4516_v27, %v4516_v27  ;;  %v3630_v38 = vpack.c.bf16 %v4516_v27, %v4508_v34 }
 0x160   :  { %v3644_v39 = vpack.c.bf16 %v731_v21, %v729_v35  ;;  %v89_v35 = vld [vmem:[%s5367_s4 + $0x30] sm:$0xff]  ;;  %v90_v21 = vld [vmem:[%s5367_s4 + $0x38] sm:$0xff] }
 0x161   :  { %3631 = vmatprep.subr.bf16.mxu1 %v3630_v38  ;;  %v3642_v40 = vpack.c.bf16 %v732_v37, %v730_v36  ;;  %v108_v36 = vld [vmem:[%s5367_s4 + $0xc8] sm:$0xff]  ;;  %v4646_v37 = vpack.c.bf16 %v90_v21, %v89_v35  ;;  %v4030_v35 = vld [vmem:[#allocation5 + $0x214] ss:$8 sps:$4 sm:$0xff]   ;;  %v122_v21 = vld [vmem:[%s5370_s7 + $0x20] sm:$0xff] }
 0x162   :  { %3633 = vmatpush1.bf16.msra.mxu1 %v3632_v30  ;;  %v107_v30 = vld [vmem:[%s5367_s4 + $0xc0] sm:$0xff]  ;;  %1468 = vmatprep.subr.bf16.mxu0 %v4030_v35 }
 0x163   :  { %v4526_v41 = vpop.f32.mrb[4].mxu0  ;;  %v4649_v38 = vpack.c.bf16 %v108_v36, %v107_v30  ;;  %v123_v30 = vld [vmem:[%s5370_s7 + $0x28] sm:$0xff]  ;;  %v4028_v36 = vld [vmem:[#allocation5 + $0x210] ss:$8 sps:$4 sm:$0xff]   ;;  %1184 = vperm.xlu0 %3951, %v122_v21  }
 0x164   :  { %v4528_v42 = vpop.f32.mrb[5].mxu0  ;;  %v733_v44 = vmul.f32 %v4526_v41, %v4526_v41  ;;  %1189 = vperm.xlu1 %3952, %v123_v30   ;;  %1469 = vmatpush1.bf16.msra.mxu0 %v4028_v36 }
 0x165   :  { %v4530_v43 = vpop.f32.mrb[6].mxu0  ;;  %v734_v48 = vmul.f32 %v4528_v42, %v4528_v42 }
 0x166   :  { %v3636_v45 = vpack.c.bf16 %v4530_v43, %v4526_v41  ;;  %v735_v46 = vmul.f32 %v4530_v43, %v4530_v43  ;;  %v4538_v47 = vpop.f32.mrb[7].mxu0 }
 0x167   :  { %v3634_v49 = vpack.c.bf16 %v4538_v47, %v4528_v42  ;;  %v736_v50 = vmul.f32 %v4538_v47, %v4538_v47 }
 0x168   :  { %v3648_v51 = vpack.c.bf16 %v735_v46, %v733_v44  ;;  %v109_v44 = vld [vmem:[%s5367_s4 + $0xd0] sm:$0xff] }
 0x169   :  { %3635 = vmatprep.subr.bf16.mxu1 %v3634_v49  ;;  %v3646_v52 = vpack.c.bf16 %v736_v50, %v734_v48  ;;  %v93_v49 = vld [vmem:[%s5367_s4 + $0x50] sm:$0xff]  ;;  %v94_v50 = vld [vmem:[%s5367_s4 + $0x58] sm:$0xff] }
 0x16a   :  { %3637 = vmatpush1.bf16.msra.mxu1 %v3636_v45  ;;  %v110_v45 = vld [vmem:[%s5367_s4 + $0xd8] sm:$0xff] }
 0x16b   :  { %v4546_v53 = vpop.f32.mrb[8].mxu0  ;;  %v4667_v48 = vpack.c.bf16 %v110_v45, %v109_v44  ;;  %v4036_v44 = vld [vmem:[#allocation5 + $0x234] ss:$8 sps:$4 sm:$0xff]   ;;  %v4034_v45 = vld [vmem:[#allocation5 + $0x230] ss:$8 sps:$4 sm:$0xff]  }
 0x16c   :  { %v4548_v54 = vpop.f32.mrb[9].mxu0  ;;  %v737_v56 = vmul.f32 %v4546_v53, %v4546_v53 }
 0x16d   :  { %v4550_v55 = vpop.f32.mrb[10].mxu0  ;;  %v738_v60 = vmul.f32 %v4548_v54, %v4548_v54 }
 0x16e   :  { %v3640_v57 = vpack.c.bf16 %v4550_v55, %v4546_v53  ;;  %v739_v58 = vmul.f32 %v4550_v55, %v4550_v55  ;;  %v4558_v59 = vpop.f32.mrb[11].mxu0 }
 0x16f   :  { %v3638_v61 = vpack.c.bf16 %v4558_v59, %v4548_v54  ;;  %v740_v62 = vmul.f32 %v4558_v59, %v4558_v59 }
 0x170   :  { %v3652_v63 = vpack.c.bf16 %v739_v58, %v737_v56  ;;  %v4682_v56 = vpack.c.bf16 %v94_v50, %v93_v49  ;;  %v95_v58 = vld [vmem:[%s5367_s4 + $0x60] sm:$0xff] }
 0x171   :  { %3639 = vmatprep.subr.bf16.mxu1 %v3638_v61  ;;  %v3650_v1 = vpack.c.bf16 %v740_v62, %v738_v60  ;;  %v96_v60 = vld [vmem:[%s5367_s4 + $0x68] sm:$0xff]  ;;  %v113_v61 = vld [vmem:[%s5367_s4 + $0xf0] sm:$0xff]  ;;  %v114_v62 = vld [vmem:[%s5367_s4 + $0xf8] sm:$0xff] }
 0x172   :  { %3641 = vmatpush1.bf16.msra.mxu1 %v3640_v57  ;;  %v4039_v49 = vld [vmem:[#allocation5 + $0x244] ss:$8 sps:$4 sm:$0xff]   ;;  %v4037_v50 = vld [vmem:[#allocation5 + $0x240] ss:$8 sps:$4 sm:$0xff]  }
 0x173   :  { %3643 = vmatprep.subr.bf16.mxu1 %v3642_v40  ;;  %v92_v40 = vld [vmem:[%s5367_s4 + $0x48] sm:$0xff] }
 0x175   :  { %3296 = vmatmul.mubr.msk.f32.vlgmr.msra.gmra.mrb[0].mxu1 %vm654_vm2, %v117_v2 }
 0x176   :  { %3645 = vmatpush1.bf16.msra.mxu1 %v3644_v39  ;;  %805 = vmatprep.mubr.f32.mxu1 %v5380_v26  ;;  %v91_v39 = vld [vmem:[%s5367_s4 + $0x40] sm:$0xff] }
 0x177   :  { %3647 = vmatprep.subr.bf16.mxu1 %v3646_v52  ;;  %v4664_v46 = vpack.c.bf16 %v92_v40, %v91_v39  ;;  %v112_v52 = vld [vmem:[%s5367_s4 + $0xe8] sm:$0xff] }
 0x178   :  { %v4033_v39 = vld [vmem:[#allocation5 + $0x224] ss:$8 sps:$4 sm:$0xff]   ;;  %v4031_v40 = vld [vmem:[#allocation5 + $0x220] ss:$8 sps:$4 sm:$0xff]  }
 0x179   :  { %1470 = vmatprep.subr.bf16.mxu0 %v4033_v39 }
 0x17a   :  { %3649 = vmatpush1.bf16.msra.mxu1 %v3648_v51  ;;  %v111_v51 = vld [vmem:[%s5367_s4 + $0xe0] sm:$0xff]  ;;  %1471 = vmatpush1.bf16.msra.mxu0 %v4031_v40 }
 0x17b   :  { %3651 = vmatprep.subr.bf16.mxu1 %v3650_v1  ;;  %v4685_v57 = vpack.c.bf16 %v112_v52, %v111_v51  ;;  %v4703_v1 = vpack.c.bf16 %v114_v62, %v113_v61  ;;  %1472 = vmatprep.subr.bf16.mxu0 %v4036_v44  ;;  %v4042_v51 = vld [vmem:[#allocation5 + $0x254] ss:$8 sps:$4 sm:$0xff]   ;;  %v4040_v52 = vld [vmem:[#allocation5 + $0x250] ss:$8 sps:$4 sm:$0xff]  }
 0x17c   :  { %v4048_v61 = vld [vmem:[#allocation5 + $0x274] ss:$8 sps:$4 sm:$0xff]   ;;  %v4046_v62 = vld [vmem:[#allocation5 + $0x270] ss:$8 sps:$4 sm:$0xff]  }
 0x17e   :  { %3653 = vmatpush1.bf16.msra.mxu1 %v3652_v63  ;;  %v4700_v63 = vpack.c.bf16 %v96_v60, %v95_v58  ;;  %1473 = vmatpush1.bf16.msra.mxu0 %v4034_v45  ;;  %v4045_v58 = vld [vmem:[#allocation5 + $0x264] ss:$8 sps:$4 sm:$0xff]   ;;  %v4043_v60 = vld [vmem:[#allocation5 + $0x260] ss:$8 sps:$4 sm:$0xff]  }
 0x17f   :  { %3655 = vmatprep.subr.bf16.mxu1 %v4577_v5  ;;  %1474 = vmatprep.subr.bf16.mxu0 %v4039_v49  ;;  %v652_v45 = vld [vmem:[%s5371_s8] sm:$0x1] }
 0x181   :  { %3297 = vmatmul.mubr.msk.f32.vlgmr.msra.gmra.mrb[2].mxu1 %vm654_vm2, %v117_v2  ;;  %v97_v2 = vld [vmem:[%s5367_s4 + $0x70] sm:$0xff] }
 0x182   :  { %3657 = vmatpush3.bf16.msra.mxu1 %v4591_v14  ;;  %v4712_v4 = vpack.c.bf16 %v98_v3, %v97_v2  ;;  %1475 = vmatpush1.bf16.msra.mxu0 %v4037_v50  ;;  %v4051_v2 = vld [vmem:[#allocation5 + $0x284] ss:$8 sps:$4 sm:$0xff]   ;;  %v4049_v3 = vld [vmem:[#allocation5 + $0x280] ss:$8 sps:$4 sm:$0xff]  }
 0x183   :  { %3659 = vmatprep.subr.bf16.mxu1 %v4594_v16  ;;  %1476 = vmatprep.subr.bf16.mxu0 %v4042_v51  ;;  %v653_v51 = vld [vmem:[%s5372_s9] sm:$0x1] }
 0x186   :  { %3661 = vmatpush3.bf16.msra.mxu1 %v4610_v23  ;;  %1477 = vmatpush1.bf16.msra.mxu0 %v4040_v52 }
 0x187   :  { %3663 = vmatprep.subr.bf16.mxu1 %v4613_v25  ;;  %1478 = vmatprep.subr.bf16.mxu0 %v4045_v58 }
 0x18a   :  { %3665 = vmatpush3.bf16.msra.mxu1 %v4628_v32  ;;  %1479 = vmatpush1.bf16.msra.mxu0 %v4043_v60  ;;  %v4063_v60 = vld [vmem:[#allocation5 + $0x2c4] ss:$8 sps:$4 sm:$0xff]  }
 0x18b   :  { %3667 = vmatprep.subr.bf16.mxu1 %v4631_v33  ;;  %1480 = vmatprep.subr.bf16.mxu0 %v4048_v61  ;;  %v4061_v61 = vld [vmem:[#allocation5 + $0x2c0] ss:$8 sps:$4 sm:$0xff]  }
 0x18e   :  { %3669 = vmatpush3.bf16.msra.mxu1 %v4646_v37  ;;  %1481 = vmatpush1.bf16.msra.mxu0 %v4046_v62  ;;  %v4066_v62 = vld [vmem:[#allocation5 + $0x2d4] ss:$8 sps:$4 sm:$0xff]  }
 0x18f   :  { %3671 = vmatprep.subr.bf16.mxu1 %v4649_v38  ;;  %1482 = vmatprep.subr.bf16.mxu0 %v4051_v2  ;;  %v4064_v2 = vld [vmem:[#allocation5 + $0x2d0] ss:$8 sps:$4 sm:$0xff]  }
 0x192   :  { %3673 = vmatpush3.bf16.msra.mxu1 %v4664_v46  ;;  %1483 = vmatpush1.bf16.msra.mxu0 %v4049_v3  ;;  %v4069_v3 = vld [vmem:[#allocation5 + $0x2e4] ss:$8 sps:$4 sm:$0xff]  }
 0x193   :  { %3675 = vmatprep.subr.bf16.mxu1 %v4667_v48 }
 0x196   :  { %3677 = vmatpush3.bf16.msra.mxu1 %v4682_v56 }
 0x197   :  { %3679 = vmatprep.subr.bf16.mxu1 %v4685_v57 }
 0x19a   :  { %3681 = vmatpush3.bf16.msra.mxu1 %v4700_v63 }
 0x19b   :  { %3683 = vmatprep.subr.bf16.mxu1 %v4703_v1 }
 0x19e   :  { %3685 = vmatpush3.bf16.msra.mxu1 %v4712_v4 }
 0x19f   :  { %3687 = vmatprep.subr.bf16.mxu1 %v4577_v5 }
 0x248   :  { %v724_v6 = vpop.f32.mrb[0].mxu1 }
 0x249   :  { %v726_v7 = vpop.f32.mrb[1].mxu1 }
 0x24a   :  { %876 = vmatprep.mubr.f32.mxu1 %v726_v7  ;;  %v4052_v7 = vld [vmem:[#allocation5 + $0x290] ss:$8 sps:$4 sm:$0xff]  }
 0x24b   :  { %877 = vmatmul.mubr.f32.vlgmr.msra.gmra.mrb[4].mxu1 %v724_v6  ;;  %v4054_v6 = vld [vmem:[#allocation5 + $0x294] ss:$8 sps:$4 sm:$0xff]  }
 0x24c   :  { %3689 = vmatpush3.bf16.msra.mxu1 %v4591_v14  ;;  %1484 = vmatprep.subr.bf16.mxu0 %v4054_v6  ;;  %v4067_v6 = vld [vmem:[#allocation5 + $0x2e0] ss:$8 sps:$4 sm:$0xff]  }
 0x24d   :  { %3691 = vmatprep.subr.bf16.mxu1 %v4594_v16  ;;  %1485 = vmatpush1.bf16.msra.mxu0 %v4052_v7  ;;  %v4072_v7 = vld [vmem:[#allocation5 + $0x2f4] ss:$8 sps:$4 sm:$0xff]  }
 0x250   :  { %3693 = vmatpush3.bf16.msra.mxu1 %v4610_v23 }
 0x251   :  { %3695 = vmatprep.subr.bf16.mxu1 %v4613_v25 }
 0x254   :  { %3697 = vmatpush3.bf16.msra.mxu1 %v4628_v32  ;;  %v807_v8 = vpop.f32.mrb[2].mxu1 }
 0x255   :  { %3699 = vmatprep.subr.bf16.mxu1 %v4631_v33  ;;  %v809_v9 = vpop.f32.mrb[3].mxu1 }
 0x256   :  { %947 = vmatprep.mubr.f32.mxu1 %v809_v9  ;;  %v4055_v9 = vld [vmem:[#allocation5 + $0x2a0] ss:$8 sps:$4 sm:$0xff]  }
 0x258   :  { %3701 = vmatpush3.bf16.msra.mxu1 %v4646_v37 }
 0x259   :  { %3703 = vmatprep.subr.bf16.mxu1 %v4649_v38 }
 0x25c   :  { %3705 = vmatpush3.bf16.msra.mxu1 %v4664_v46 }
 0x25d   :  { %3707 = vmatprep.subr.bf16.mxu1 %v4667_v48 }
 0x260   :  { %3709 = vmatpush3.bf16.msra.mxu1 %v4682_v56 }
 0x261   :  { %3711 = vmatprep.subr.bf16.mxu1 %v4685_v57 }
 0x264   :  { %3713 = vmatpush3.bf16.msra.mxu1 %v4700_v63 }
 0x265   :  { %3715 = vmatprep.subr.bf16.mxu1 %v4703_v1 }
 0x268   :  { %3717 = vmatpush3.bf16.msra.mxu1 %v4712_v4 }
 0x269   :  { %965 = vmatprep.subr.mxu1 %v4736_v17 }
 0x26b   :  { %948 = vmatmul.mubr.f32.vlgmr.msra.gmra.mrb[6].mxu1 %v807_v8  ;;  %v4057_v8 = vld [vmem:[#allocation5 + $0x2a4] ss:$8 sps:$4 sm:$0xff]  }
 0x26c   :  { %1029 = vmatprep.mubr.f32.mxu1 %v5380_v26  ;;  %966 = vmatpush1.msra.mxu1 %v4741_v18 }
 0x26d   :  { %1039 = vmatprep.subr.mxu1 %v4736_v17  ;;  %1486 = vmatprep.subr.bf16.mxu0 %v4057_v8  ;;  %v4070_v8 = vld [vmem:[#allocation5 + $0x2f0] ss:$8 sps:$4 sm:$0xff]  }
 0x26e   :  { %1487 = vmatpush1.bf16.msra.mxu0 %v4055_v9  ;;  %v4075_v9 = vld [vmem:[#allocation5 + $0x104] ss:$8 sps:$4 sm:$0xff]  }
 0x26f   :  { %1488 = vmatprep.subr.bf16.mxu0 %v4060_v12  ;;  %v4776_v12 = vsub.s32 0, %v4385_v10  ;;  %v4087_v10 = vld [vmem:[#allocation5 + $0x144] ss:$8 sps:$4 sm:$0xff]  }
 0x272   :  { %1489 = vmatpush1.bf16.msra.mxu0 %v4058_v13  ;;  %v4778_v13 = vpop.permute.xlu1 %1174 }
 0x273   :  { %1490 = vmatprep.subr.bf16.mxu0 %v4063_v60 }
 0x276   :  { %1491 = vmatpush1.bf16.msra.mxu0 %v4061_v61 }
 0x277   :  { %1492 = vmatprep.subr.bf16.mxu0 %v4066_v62 }
 0x27a   :  { %1493 = vmatpush1.bf16.msra.mxu0 %v4064_v2 }
 0x27b   :  { %1494 = vmatprep.subr.bf16.mxu0 %v4069_v3 }
 0x27e   :  { %1495 = vmatpush1.bf16.msra.mxu0 %v4067_v6 }
 0x27f   :  { %1496 = vmatprep.subr.bf16.mxu0 %v4072_v7 }
 0x282   :  { %1497 = vmatpush1.bf16.msra.mxu0 %v4070_v8 }
 0x283   :  { %1689 = vmatprep.subr.bf16.mxu0 %v4075_v9 }
 0x31e   :  { %v3452_v15 = vpop.f32.mrb[4].mxu1 }
 0x31f   :  { %v3453_v22 = vpop.f32.mrb[5].mxu1 }
 0x320   :  { %v3454_v28 = vadd.f32 %v3453_v22, %v3452_v15  ;;  %v4780_v15 = vpop.permute.xlu0 %1164 }
 0x322   :  { %v882_v31 = vmul.f32 0.001953125, %v3454_v28 }
 0x324   :  { %v954_v36 = vmul.f32 %v882_v31, %v882_v31 }
 0x33e   :  { %v3487_v35 = vpop.f32.mrb[6].mxu1 }
 0x33f   :  { %v3488_v21 = vpop.f32.mrb[7].mxu1 }
 0x340   :  { %v3489_v30 = vadd.f32 %v3488_v21, %v3487_v35 }
 0x342   :  { %v953_v39 = vmul.f32 0.001953125, %v3489_v30 }
 0x344   :  { %v955_v40 = vsub.f32 %v953_v39, %v954_v36 }
 0x346   :  { %v956_v44 = vadd.f32 1e-05, %v955_v40 }
 0x348   :  { %4193 = vrsqrt.f32 %v956_v44  ;;  %v1180_v44 = vpop.permute.xlu1 %1179 }
 0x352   :  { %v4194_v49 = vpop.eup %4193 }
 0x353   :  { %v958_v50 = vmul.f32 %v4194_v49, %v652_v45 }
 0x355   :  { %3298 = vmatmul.mubr.msk.f32.vlgmr.msra.gmra.mrb[8].mxu1 %vm961_vm3, %v958_v50  ;;  %v959_v52 = vmul.f32 %v958_v50, %v882_v31 }
 0x356   :  { %1040 = vmatpush1.msra.mxu1 %v4741_v18  ;;  %1103 = vmatprep.mubr.f32.mxu1 %v5380_v26 }
 0x357   :  { %v960_v58 = vsub.f32 %v653_v51, %v959_v52  ;;  %v4792_v52 = vpop.permute.xlu0 %1169 }
 0x359   :  { %3299 = vmatmul.mubr.msk.f32.vlgmr.msra.gmra.mrb[10].mxu1 %vm961_vm3, %v960_v58 }
 0x35a   :  { %2115 = vmatprep.mubr.f32.mxu1 %v5380_v26 }
 0x428   :  { %v1031_v22 = vpop.f32.mrb[8].mxu1 }
 0x429   :  { %v1113_v28 = vrot.slane %v1031_v22, %v4776_v12  ;;  %v1033_v31 = vpop.f32.mrb[9].mxu1 }
 0x42a   :  { %v1117_v35 = vrot.slane %v1033_v31, %v4776_v12 }
 0x42b   :  { %v1118_v21 = vmul.f32 %v1113_v28, %v4506_v29  ;;  %v1120_v30 = vmul.f32 %v1113_v28, %v4510_v20  ;;  %v1122_v36 = vmul.f32 %v1113_v28, %v4526_v41  ;;  %v1124_v39 = vmul.f32 %v1113_v28, %v4530_v43 }
 0x42c   :  { %v1105_v40 = vpop.f32.mrb[10].mxu1  ;;  %v1125_v45 = vmul.f32 %v1117_v35, %v4538_v47  ;;  %v1126_v49 = vmul.f32 %v1113_v28, %v4546_v53  ;;  %v1127_v50 = vmul.f32 %v1117_v35, %v4548_v54  ;;  %v1128_v51 = vmul.f32 %v1113_v28, %v4550_v55 }
 0x42d   :  { %v1133_v29 = vrot.slane %v1105_v40, %v4776_v12  ;;  %v1107_v58 = vpop.f32.mrb[11].mxu1  ;;  %v1129_v20 = vmul.f32 %v1117_v35, %v4558_v59  ;;  %v1119_v41 = vmul.f32 %v1117_v35, %v4508_v34  ;;  %v1121_v43 = vmul.f32 %v1117_v35, %v4516_v27  ;;  %v1190_v27 = vpop.permute.xlu1 %1189 }
 0x42e   :  { %v1137_v60 = vrot.slane %v1107_v58, %v4776_v12  ;;  %v1123_v47 = vmul.f32 %v1117_v35, %v4528_v42  ;;  %v1185_v35 = vpop.permute.xlu0 %1184 }
 0x42f   :  { %v1138_v53 = vadd.f32 %v1133_v29, %v1118_v21  ;;  %v1140_v61 = vadd.f32 %v1133_v29, %v1120_v30  ;;  %v1142_v54 = vadd.f32 %v1133_v29, %v1122_v36  ;;  %v1144_v62 = vadd.f32 %v1133_v29, %v1124_v39 }
 0x430   :  { %v1145_v55 = vadd.f32 %v1137_v60, %v1125_v45  ;;  %v1146_v2 = vadd.f32 %v1133_v29, %v1126_v49  ;;  %v1147_v3 = vadd.f32 %v1137_v60, %v1127_v50  ;;  %v1148_v6 = vadd.f32 %v1133_v29, %v1128_v51 }
 0x431   :  { %v1150_v7 = vmax.f32 %v1138_v53, 0.0  ;;  %v1152_v8 = vmax.f32 %v1140_v61, 0.0  ;;  %v1154_v9 = vmax.f32 %v1142_v54, 0.0  ;;  %v1156_v59 = vmax.f32 %v1144_v62, 0.0  ;;  %v4078_v54 = vld [vmem:[#allocation5 + $0x114] ss:$8 sps:$4 sm:$0xff]  }
 0x432   :  { %v1157_v22 = vmax.f32 %v1145_v55, 0.0  ;;  %v1158_v34 = vmax.f32 %v1146_v2, 0.0  ;;  %v1159_v28 = vmax.f32 %v1147_v3, 0.0  ;;  %v1149_v31 = vadd.f32 %v1137_v60, %v1129_v20 }
 0x433   :  { %v4801_v40 = vmul.f32 %v4778_v13, %v1154_v9  ;;  %v4803_v42 = vmul.f32 %v1180_v44, %v1156_v59  ;;  %v1160_v21 = vmax.f32 %v1148_v6, 0.0  ;;  %v4806_v30 = vmul.f32 %v4780_v15, %v1150_v7 }
 0x434   :  { %v4808_v36 = vmul.f32 %v1180_v44, %v1157_v22  ;;  %v4810_v39 = vmul.f32 %v1185_v35, %v1158_v34  ;;  %v4812_v45 = vmul.f32 %v1185_v35, %v1159_v28  ;;  %v1161_v49 = vmax.f32 %v1149_v31, 0.0 }
 0x435   :  { %v1249_v50 = vrot.slane %v4803_v42, 1  ;;  %v4817_v29 = vmul.f32 %v4792_v52, %v1152_v8  ;;  %v4819_v58 = vmul.f32 %v1190_v27, %v1160_v21  ;;  %v1752_v3 = vrot.slane %v4806_v30, 7 }
 0x436   :  { %v1250_v20 = vrot.slane %v4808_v36, 1  ;;  %v1251_v44 = vrot.slane %v4810_v39, 1  ;;  %v1252_v61 = vrot.slane %v4812_v45, 1  ;;  %v1761_v62 = vrot.slane %v4812_v45, 7 }
 0x437   :  { %v4827_v55 = vmul.f32 %v1190_v27, %v1161_v49  ;;  %v1253_v2 = vrot.slane %v4819_v58, 1  ;;  %v5382_v6 = vrot.slane %v4817_v29, 7  ;;  %v1762_v7 = vrot.slane %v4819_v58, 7 }
 0x438   :  { %v1139_v8 = vadd.f32 %v1137_v60, %v1119_v41  ;;  %v1141_v22 = vadd.f32 %v1137_v60, %v1121_v43  ;;  %v1143_v34 = vadd.f32 %v1137_v60, %v1123_v47  ;;  %v1243_v35 = vrot.slane %v4806_v30, 1 }
 0x439   :  { %v1254_v9 = vrot.slane %v4827_v55, 1  ;;  %v1763_v59 = vrot.slane %v4827_v55, 7  ;;  %v4839_v28 = vsel %vm471_vm0, %v1752_v3, %v5382_v6  ;;  %v4843_v27 = vsel %vm471_vm0, %v1762_v7, %v1752_v3 }
 0x43a   :  { %v1151_v31 = vmax.f32 %v1139_v8, 0.0  ;;  %v1153_v21 = vmax.f32 %v1141_v22, 0.0  ;;  %v1155_v49 = vmax.f32 %v1143_v34, 0.0  ;;  %v1245_v43 = vrot.slane %v4817_v29, 1 }
 0x43b   :  { %v1247_v47 = vrot.slane %v4801_v40, 1  ;;  %v1258_v0 = vsel %vm152_vm1, %v1250_v20, %v1252_v61  ;;  %v1257_v3 = vsel %vm152_vm1, %v1249_v50, %v1251_v44  ;;  %v1265_v51 = vsel %vm152_vm1, %v1253_v2, %v1243_v35 }
 0x43c   :  { %v4850_v60 = vmul.f32 %v4780_v15, %v1151_v31  ;;  %v4858_v8 = vmul.f32 %v4792_v52, %v1153_v21  ;;  %v4861_v26 = vmul.f32 %v4778_v13, %v1155_v49  ;;  %v1263_v22 = vsel %vm152_vm1, %v1243_v35, %v1245_v43 }
 0x43d   :  { %v1256_v15 = vsel %vm152_vm1, %v1252_v61, %v1254_v9  ;;  %v1261_v31 = vsel %vm152_vm1, %v1245_v43, %v1247_v47  ;;  %v1259_v41 = vsel %vm152_vm1, %v1247_v47, %v1249_v50  ;;  %v1255_v52 = vsel %vm152_vm1, %v1251_v44, %v1253_v2 }
 0x43e   :  { %v1244_v34 = vrot.slane %v4850_v60, 1  ;;  %v1246_v13 = vrot.slane %v4858_v8, 1  ;;  %v1248_v21 = vrot.slane %v4861_v26, 1  ;;  %v1267_v49 = vpack.c.bf16 %v1261_v31, %v1263_v22  ;;  %v4073_v22 = vld [vmem:[#allocation5 + $0x100] ss:$8 sps:$4 sm:$0xff]  }
 0x43f   :  { %v1269_v6 = vpack.c.bf16 %v1257_v3, %v1259_v41  ;;  %v1205_v43 = vpack.c.bf16 %v4858_v8, %v4850_v60  ;;  %v1271_v2 = vpack.c.bf16 %v1265_v51, %v1255_v52  ;;  %v1207_v35 = vpack.c.bf16 %v4808_v36, %v4861_v26 }
 0x440   :  { %v1266_v61 = vsel %vm152_vm1, %v1254_v9, %v1244_v34  ;;  %v1262_v44 = vsel %vm152_vm1, %v1246_v13, %v1248_v21  ;;  %v1264_v47 = vsel %vm152_vm1, %v1244_v34, %v1246_v13  ;;  %v1260_v41 = vsel %vm152_vm1, %v1248_v21, %v1250_v20 }
 0x441   :  { %v1272_v3 = vpack.c.bf16 %v1266_v61, %v1256_v15  ;;  %v1268_v9 = vpack.c.bf16 %v1262_v44, %v1264_v47  ;;  %v1270_v31 = vpack.c.bf16 %v1258_v0, %v1260_v41  ;;  %v1206_v50 = vpack.c.bf16 %v4803_v42, %v4801_v40  ;;  %v4076_v47 = vld [vmem:[#allocation5 + $0x110] ss:$8 sps:$4 sm:$0xff]  }
 0x442   :  { %v1209_v53 = vpack.c.bf16 %v4827_v55, %v4812_v45  ;;  %v1208_v34 = vpack.c.bf16 %v4819_v58, %v4810_v39  ;;  %v1753_v20 = vrot.slane %v4850_v60, 7  ;;  %v1755_v15 = vrot.slane %v4858_v8, 7  ;;  %v4139_v45 = vld [vmem:[#allocation5 + $0x60] ss:$8 sps:$4 sm:$0xff]   ;;  %v4142_v55 = vld [vmem:[#allocation5 + $0x70] ss:$8 sps:$4 sm:$0xff]  }
 0x443   :  { %1498 = vmatprep.mubr.bf16.mxu0 %v1268_v9  ;;  %v1757_v0 = vrot.slane %v4861_v26, 7  ;;  %v1756_v51 = vrot.slane %v4801_v40, 7  ;;  %v4904_v52 = vsel %vm471_vm0, %v1761_v62, %v1763_v59  ;;  %v5383_v21 = vrot.slane %v4808_v36, 7  ;;  %v4135_v26 = vld [vmem:[#allocation5 + $0x44] ss:$8 sps:$4 sm:$0xff]  }
 0x444   :  { %1499 = vmatmul.mubr.bf16.vlgmr.msra.gmra.mrb[12].mxu0 %v1267_v49  ;;  %v4908_v13 = vsel %vm471_vm0, %v1763_v59, %v1753_v20  ;;  %v5384_v8 = vrot.slane %v4810_v39, 7  ;;  %v5386_v49 = vrot.slane %v4803_v42, 7  ;;  %v4133_v36 = vld [vmem:[#allocation5 + $0x40] ss:$8 sps:$4 sm:$0xff]   ;;  %v4136_v40 = vld [vmem:[#allocation5 + $0x50] ss:$8 sps:$4 sm:$0xff]  }
 0x445   :  { %v4914_v60 = vsel %vm471_vm0, %v5383_v21, %v1761_v62  ;;  %1690 = vmatpush1.bf16.msra.mxu0 %v4073_v22  ;;  %1508 = vmatprep.mubr.bf16.mxu0 %v1270_v31  ;;  %v4932_v62 = vsel %vm471_vm0, %v1753_v20, %v1755_v15  ;;  %v5387_v41 = vmov %v5383_v21  ;;  %v4942_v9 = vsel %vm471_vm0, %v1755_v15, %v1757_v0  ;;  %v4081_v21 = vld [vmem:[#allocation5 + $0x124] ss:$8 sps:$4 sm:$0xff]   ;;  %v4082_v31 = vld [vmem:[#allocation5 + $0x130] ss:$8 sps:$4 sm:$0xff]   ;;  %v4150_v39 = vld [vmem:[#allocation5 + $0x94] ss:$8 sps:$4 sm:$0xff]  }
 0x446   :  { %v4920_v61 = vsel %vm471_vm0, %v5384_v8, %v1762_v7  ;;  %v5385_v44 = vmov %v5384_v8  ;;  %v4938_v7 = vsel %vm471_vm0, %v1757_v0, %v5387_v41  ;;  %1691 = vmatprep.subr.bf16.mxu0 %v4078_v54  ;;  %v1777_v22 = vpack.c.bf16 %v4932_v62, %v4908_v13  ;;  %v4079_v41 = vld [vmem:[#allocation5 + $0x120] ss:$8 sps:$4 sm:$0xff]   ;;  %v4088_v0 = vld [vmem:[#allocation5 + $0x150] ss:$8 sps:$4 sm:$0xff]   ;;  %v4141_v42 = vld [vmem:[#allocation5 + $0x64] ss:$8 sps:$4 sm:$0xff]  }
 0x447   :  { %v4928_v59 = vsel %vm471_vm0, %v5386_v49, %v5385_v44  ;;  %v5388_v20 = vmov %v5386_v49  ;;  %v5389_v44 = vrot.slane %v4817_v29, 7  ;;  %v4093_v49 = vld [vmem:[#allocation5 + $0x164] ss:$8 sps:$4 sm:$0xff]   ;;  %v4148_v58 = vld [vmem:[#allocation5 + $0x90] ss:$8 sps:$4 sm:$0xff]  }
 0x448   :  { %v4952_v8 = vsel %vm471_vm0, %v1756_v51, %v5388_v20  ;;  %v4084_v20 = vld [vmem:[#allocation5 + $0x134] ss:$8 sps:$4 sm:$0xff]   ;;  %v4151_v13 = vld [vmem:[#allocation5 + $0xa0] ss:$8 sps:$4 sm:$0xff]  }
 0x449   :  { %v4958_v15 = vsel %vm471_vm0, %v5389_v44, %v1756_v51  ;;  %1692 = vmatpush1.bf16.msra.mxu0 %v4076_v47  ;;  %v4085_v51 = vld [vmem:[#allocation5 + $0x140] ss:$8 sps:$4 sm:$0xff]   ;;  %v4090_v44 = vld [vmem:[#allocation5 + $0x154] ss:$8 sps:$4 sm:$0xff]  }
 0x44a   :  { %v1778_v54 = vpack.c.bf16 %v4952_v8, %v4958_v15  ;;  %1693 = vmatprep.subr.bf16.mxu0 %v4081_v21  ;;  %v4091_v47 = vld [vmem:[#allocation5 + $0x160] ss:$8 sps:$4 sm:$0xff]   ;;  %v4096_v21 = vld [vmem:[#allocation5 + $0x174] ss:$8 sps:$4 sm:$0xff]  }
 0x44b   :  { %v4156_v62 = vld [vmem:[#allocation5 + $0xb4] ss:$8 sps:$4 sm:$0xff]  }
 0x44c   :  { %1509 = vmatmul.mubr.bf16.gmra.mrb[16].mxu0 %v1269_v6  ;;  %v4094_v6 = vld [vmem:[#allocation5 + $0x170] ss:$8 sps:$4 sm:$0xff]  }
 0x44d   :  { %1694 = vmatpush1.bf16.msra.mxu0 %v4079_v41  ;;  %1518 = vmatprep.mubr.bf16.mxu0 %v1272_v3  ;;  %v4099_v3 = vld [vmem:[#allocation5 + $0x184] ss:$8 sps:$4 sm:$0xff]   ;;  %v4097_v41 = vld [vmem:[#allocation5 + $0x180] ss:$8 sps:$4 sm:$0xff]  }
 0x44e   :  { %1695 = vmatprep.subr.bf16.mxu0 %v4084_v20  ;;  %v4100_v20 = vld [vmem:[#allocation5 + $0x190] ss:$8 sps:$4 sm:$0xff]  }
 0x451   :  { %1696 = vmatpush1.bf16.msra.mxu0 %v4082_v31  ;;  %v4102_v31 = vld [vmem:[#allocation5 + $0x194] ss:$8 sps:$4 sm:$0xff]  }
 0x452   :  { %1697 = vmatprep.subr.bf16.mxu0 %v4087_v10  ;;  %v4108_v10 = vld [vmem:[#allocation5 + $0x1b4] ss:$8 sps:$4 sm:$0xff]  }
 0x454   :  { %1519 = vmatmul.mubr.bf16.gmra.mrb[20].mxu0 %v1271_v2  ;;  %v4105_v2 = vld [vmem:[#allocation5 + $0x1a4] ss:$8 sps:$4 sm:$0xff]  }
 0x455   :  { %1698 = vmatpush1.bf16.msra.mxu0 %v4085_v51  ;;  %1721 = vmatprep.mubr.bf16.mxu0 %v1205_v43  ;;  %v4103_v43 = vld [vmem:[#allocation5 + $0x1a0] ss:$8 sps:$4 sm:$0xff]  }
 0x456   :  { %1699 = vmatprep.subr.bf16.mxu0 %v4090_v44  ;;  %v4109_v51 = vld [vmem:[#allocation5 + $0x1c0] ss:$8 sps:$4 sm:$0xff]   ;;  %v4114_v44 = vld [vmem:[#allocation5 + $0x1d4] ss:$8 sps:$4 sm:$0xff]  }
 0x459   :  { %1700 = vmatpush1.bf16.msra.mxu0 %v4088_v0  ;;  %v4106_v0 = vld [vmem:[#allocation5 + $0x1b0] ss:$8 sps:$4 sm:$0xff]  }
 0x45a   :  { %1701 = vmatprep.subr.bf16.mxu0 %v4093_v49  ;;  %v4111_v49 = vld [vmem:[#allocation5 + $0x1c4] ss:$8 sps:$4 sm:$0xff]  }
 0x45d   :  { %1702 = vmatpush1.bf16.msra.mxu0 %v4091_v47  ;;  %v4112_v47 = vld [vmem:[#allocation5 + $0x1d0] ss:$8 sps:$4 sm:$0xff]  }
 0x45e   :  { %1703 = vmatprep.subr.bf16.mxu0 %v4096_v21  ;;  %v4117_v21 = vld [vmem:[#allocation5 + $0x1e4] ss:$8 sps:$4 sm:$0xff]  }
 0x461   :  { %1704 = vmatpush1.bf16.msra.mxu0 %v4094_v6  ;;  %v4115_v6 = vld [vmem:[#allocation5 + $0x1e0] ss:$8 sps:$4 sm:$0xff]  }
 0x462   :  { %1705 = vmatprep.subr.bf16.mxu0 %v4099_v3  ;;  %v4120_v3 = vld [vmem:[#allocation5 + $0x1f4] ss:$8 sps:$4 sm:$0xff]  }
 0x465   :  { %1706 = vmatpush1.bf16.msra.mxu0 %v4097_v41  ;;  %v4118_v41 = vld [vmem:[#allocation5 + $0x1f0] ss:$8 sps:$4 sm:$0xff]  }
 0x466   :  { %1707 = vmatprep.subr.bf16.mxu0 %v4102_v31  ;;  %v4123_v31 = vld [vmem:[#allocation5 + $0x4] ss:$8 sps:$4 sm:$0xff]  }
 0x469   :  { %1708 = vmatpush1.bf16.msra.mxu0 %v4100_v20  ;;  %v4121_v20 = vld [vmem:[#allocation5] ss:$8 sps:$4 sm:$0xff]  }
 0x46a   :  { %1709 = vmatprep.subr.bf16.mxu0 %v4105_v2  ;;  %v4126_v2 = vld [vmem:[#allocation5 + $0x14] ss:$8 sps:$4 sm:$0xff]  }
 0x46d   :  { %1710 = vmatpush1.bf16.msra.mxu0 %v4103_v43  ;;  %v5390_v43 = vpack.c.bf16 %v4817_v29, %v4806_v30  ;;  %v4130_v30 = vld [vmem:[#allocation5 + $0x30] ss:$8 sps:$4 sm:$0xff]   ;;  %v4138_v29 = vld [vmem:[#allocation5 + $0x54] ss:$8 sps:$4 sm:$0xff]  }
 0x46e   :  { %1711 = vmatprep.subr.bf16.mxu0 %v4108_v10  ;;  %v4124_v10 = vld [vmem:[#allocation5 + $0x10] ss:$8 sps:$4 sm:$0xff]  }
 0x471   :  { %1712 = vmatpush1.bf16.msra.mxu0 %v4106_v0  ;;  %v4129_v0 = vld [vmem:[#allocation5 + $0x24] ss:$8 sps:$4 sm:$0xff]  }
 0x472   :  { %1713 = vmatprep.subr.bf16.mxu0 %v4111_v49  ;;  %v4127_v49 = vld [vmem:[#allocation5 + $0x20] ss:$8 sps:$4 sm:$0xff]  }
 0x475   :  { %1714 = vmatpush1.bf16.msra.mxu0 %v4109_v51  ;;  %v4132_v51 = vld [vmem:[#allocation5 + $0x34] ss:$8 sps:$4 sm:$0xff]  }
 0x476   :  { %1715 = vmatprep.subr.bf16.mxu0 %v4114_v44  ;;  %v4159_v44 = vld [vmem:[#allocation5 + $0xc4] ss:$8 sps:$4 sm:$0xff]  }
 0x479   :  { %1716 = vmatpush1.bf16.msra.mxu0 %v4112_v47  ;;  %v4157_v47 = vld [vmem:[#allocation5 + $0xc0] ss:$8 sps:$4 sm:$0xff]  }
 0x47a   :  { %1717 = vmatprep.subr.bf16.mxu0 %v4117_v21  ;;  %v4162_v21 = vld [vmem:[#allocation5 + $0xd4] ss:$8 sps:$4 sm:$0xff]  }
 0x47d   :  { %1718 = vmatpush1.bf16.msra.mxu0 %v4115_v6  ;;  %v4160_v6 = vld [vmem:[#allocation5 + $0xd0] ss:$8 sps:$4 sm:$0xff]  }
 0x47e   :  { %1719 = vmatprep.subr.bf16.mxu0 %v4120_v3  ;;  %v4165_v3 = vld [vmem:[#allocation5 + $0xe4] ss:$8 sps:$4 sm:$0xff]  }
 0x481   :  { %1720 = vmatpush1.bf16.msra.mxu0 %v4118_v41  ;;  %v4163_v41 = vld [vmem:[#allocation5 + $0xe0] ss:$8 sps:$4 sm:$0xff]  }
 0x482   :  { %1974 = vmatprep.subr.bf16.mxu0 %v4123_v31  ;;  %v4168_v31 = vld [vmem:[#allocation5 + $0xf4] ss:$8 sps:$4 sm:$0xff]  }
 0x484   :  { %1722 = vmatmul.mubr.bf16.vlgmr.msra.gmra.mrb[12].mxu0 %v5390_v43  ;;  %v5392_v43 = vpack.c.bf16 %v4938_v7, %v4942_v9 }
 0x485   :  { %1731 = vmatprep.mubr.bf16.mxu0 %v1207_v35  ;;  %1975 = vmatpush1.bf16.msra.mxu0 %v4121_v20  ;;  %v4145_v35 = vld [vmem:[#allocation5 + $0x80] ss:$8 sps:$4 sm:$0xff]   ;;  %v4166_v20 = vld [vmem:[#allocation5 + $0xf0] ss:$8 sps:$4 sm:$0xff]  }
 0x486   :  { %1976 = vmatprep.subr.bf16.mxu0 %v4126_v2  ;;  %v5391_v2 = vpack.c.bf16 %v4839_v28, %v4843_v27  ;;  %v5393_v28 = vpack.c.bf16 %v4904_v52, %v4914_v60  ;;  %v5394_v27 = vpack.c.bf16 %v4920_v61, %v4928_v59 }
 0x489   :  { %1977 = vmatpush1.bf16.msra.mxu0 %v4124_v10 }
 0x48a   :  { %1978 = vmatprep.subr.bf16.mxu0 %v4129_v0 }
 0x48c   :  { %1732 = vmatmul.mubr.bf16.gmra.mrb[16].mxu0 %v1206_v50  ;;  %v4147_v50 = vld [vmem:[#allocation5 + $0x84] ss:$8 sps:$4 sm:$0xff]  }
 0x48d   :  { %1741 = vmatprep.mubr.bf16.mxu0 %v1209_v53  ;;  %1979 = vmatpush1.bf16.msra.mxu0 %v4127_v49  ;;  %v4144_v53 = vld [vmem:[#allocation5 + $0x74] ss:$8 sps:$4 sm:$0xff]  }
 0x48e   :  { %1980 = vmatprep.subr.bf16.mxu0 %v4132_v51 }
 0x491   :  { %1981 = vmatpush1.bf16.msra.mxu0 %v4130_v30 }
 0x492   :  { %1982 = vmatprep.subr.bf16.mxu0 %v4135_v26 }
 0x494   :  { %1742 = vmatmul.mubr.bf16.gmra.mrb[20].mxu0 %v1208_v34  ;;  %v4153_v34 = vld [vmem:[#allocation5 + $0xa4] ss:$8 sps:$4 sm:$0xff]  }
 0x495   :  { %1983 = vmatpush1.bf16.msra.mxu0 %v4133_v36  ;;  %2006 = vmatprep.mubr.bf16.mxu0 %v1777_v22  ;;  %v4154_v22 = vld [vmem:[#allocation5 + $0xb0] ss:$8 sps:$4 sm:$0xff]  }
 0x496   :  { %1984 = vmatprep.subr.bf16.mxu0 %v4138_v29 }
 0x499   :  { %1985 = vmatpush1.bf16.msra.mxu0 %v4136_v40 }
 0x49a   :  { %1986 = vmatprep.subr.bf16.mxu0 %v4141_v42 }
 0x49d   :  { %1987 = vmatpush1.bf16.msra.mxu0 %v4139_v45 }
 0x49e   :  { %1988 = vmatprep.subr.bf16.mxu0 %v4144_v53 }
 0x4a1   :  { %1989 = vmatpush1.bf16.msra.mxu0 %v4142_v55 }
 0x4a2   :  { %1990 = vmatprep.subr.bf16.mxu0 %v4147_v50 }
 0x4a5   :  { %1991 = vmatpush1.bf16.msra.mxu0 %v4145_v35 }
 0x4a6   :  { %1992 = vmatprep.subr.bf16.mxu0 %v4150_v39 }
 0x4a9   :  { %1993 = vmatpush1.bf16.msra.mxu0 %v4148_v58 }
 0x4aa   :  { %1994 = vmatprep.subr.bf16.mxu0 %v4153_v34 }
 0x4ad   :  { %1995 = vmatpush1.bf16.msra.mxu0 %v4151_v13 }
 0x4ae   :  { %1996 = vmatprep.subr.bf16.mxu0 %v4156_v62 }
 0x4b1   :  { %1997 = vmatpush1.bf16.msra.mxu0 %v4154_v22 }
 0x4b2   :  { %1998 = vmatprep.subr.bf16.mxu0 %v4159_v44 }
 0x4b5   :  { %1999 = vmatpush1.bf16.msra.mxu0 %v4157_v47 }
 0x4b6   :  { %2000 = vmatprep.subr.bf16.mxu0 %v4162_v21 }
 0x4b9   :  { %2001 = vmatpush1.bf16.msra.mxu0 %v4160_v6 }
 0x4ba   :  { %2002 = vmatprep.subr.bf16.mxu0 %v4165_v3 }
 0x4bd   :  { %2003 = vmatpush1.bf16.msra.mxu0 %v4163_v41 }
 0x4be   :  { %2004 = vmatprep.subr.bf16.mxu0 %v4168_v31  ;;  %v5078_v31 = vld [vmem:[%s5369_s6] sm:$0x1] }
 0x4c1   :  { %2005 = vmatpush1.bf16.msra.mxu0 %v4166_v20  ;;  %v5395_v20 = vmov 0.0  }
 0x4c2   :  { %3863 = vmatprep.subr.bf16.mxu0 %v4577_v5 }
 0x4c4   :  { %2007 = vmatmul.mubr.bf16.vlgmr.msra.gmra.mrb[12].mxu0 %v5391_v2 }
 0x4c5   :  { %2016 = vmatprep.mubr.bf16.mxu0 %v5392_v43  ;;  %3865 = vmatpush3.bf16.msra.mxu0 %v4591_v14 }
 0x4c6   :  { %3867 = vmatprep.subr.bf16.mxu0 %v4594_v16 }
 0x4c9   :  { %3869 = vmatpush3.bf16.msra.mxu0 %v4610_v23 }
 0x4ca   :  { %3871 = vmatprep.subr.bf16.mxu0 %v4613_v25 }
 0x4cc   :  { %2017 = vmatmul.mubr.bf16.gmra.mrb[16].mxu0 %v1778_v54 }
 0x4cd   :  { %2026 = vmatprep.mubr.bf16.mxu0 %v5393_v28  ;;  %3873 = vmatpush3.bf16.msra.mxu0 %v4628_v32 }
 0x4ce   :  { %3875 = vmatprep.subr.bf16.mxu0 %v4631_v33 }
 0x4d1   :  { %3877 = vmatpush3.bf16.msra.mxu0 %v4646_v37 }
 0x4d2   :  { %3879 = vmatprep.subr.bf16.mxu0 %v4649_v38 }
 0x4d4   :  { %2027 = vmatmul.mubr.bf16.gmra.mrb[20].mxu0 %v5394_v27 }
 0x4d5   :  { %3881 = vmatpush3.bf16.msra.mxu0 %v4664_v46 }
 0x4d6   :  { %3883 = vmatprep.subr.bf16.mxu0 %v4667_v48 }
 0x4d9   :  { %3885 = vmatpush3.bf16.msra.mxu0 %v4682_v56 }
 0x4da   :  { %3887 = vmatprep.subr.bf16.mxu0 %v4685_v57 }
 0x4dd   :  { %3889 = vmatpush3.bf16.msra.mxu0 %v4700_v63 }
 0x4de   :  { %3891 = vmatprep.subr.bf16.mxu0 %v4703_v1 }
 0x4e1   :  { %3893 = vmatpush3.bf16.msra.mxu0 %v4712_v4 }
 0x597   :  { %v5015_v52 = vpop.f32.mrb[12].mxu0 }
 0x598   :  { %v5017_v60 = vpop.f32.mrb[13].mxu0  ;;  %v2122_v59 = vmul.f32 %v5015_v52, %v5015_v52 }
 0x599   :  { %v5019_v61 = vpop.f32.mrb[14].mxu0  ;;  %v2123_v15 = vmul.f32 %v5017_v60, %v5017_v60 }
 0x59a   :  { %v3720_v7 = vpack.c.bf16 %v5019_v61, %v5015_v52  ;;  %v2124_v9 = vmul.f32 %v5019_v61, %v5019_v61  ;;  %v5027_v8 = vpop.f32.mrb[15].mxu0 }
 0x59b   :  { %v3718_v54 = vpack.c.bf16 %v5027_v8, %v5017_v60  ;;  %v2125_v10 = vmul.f32 %v5027_v8, %v5027_v8 }
 0x59c   :  { %v3732_v0 = vpack.c.bf16 %v2124_v9, %v2122_v59 }
 0x59d   :  { %3719 = vmatprep.subr.bf16.mxu1 %v3718_v54  ;;  %v3730_v49 = vpack.c.bf16 %v2125_v10, %v2123_v15 }
 0x59e   :  { %3721 = vmatpush1.bf16.msra.mxu1 %v3720_v7 }
 0x59f   :  { %v5035_v51 = vpop.f32.mrb[16].mxu0 }
 0x5a0   :  { %v5037_v30 = vpop.f32.mrb[17].mxu0  ;;  %v2126_v36 = vmul.f32 %v5035_v51, %v5035_v51 }
 0x5a1   :  { %v5039_v26 = vpop.f32.mrb[18].mxu0  ;;  %v2127_v45 = vmul.f32 %v5037_v30, %v5037_v30 }
 0x5a2   :  { %v3724_v29 = vpack.c.bf16 %v5039_v26, %v5035_v51  ;;  %v2128_v40 = vmul.f32 %v5039_v26, %v5039_v26  ;;  %v5047_v42 = vpop.f32.mrb[19].mxu0 }
 0x5a3   :  { %v3722_v53 = vpack.c.bf16 %v5047_v42, %v5037_v30  ;;  %v2129_v55 = vmul.f32 %v5047_v42, %v5047_v42 }
 0x5a4   :  { %v3736_v50 = vpack.c.bf16 %v2128_v40, %v2126_v36 }
 0x5a5   :  { %3723 = vmatprep.subr.bf16.mxu1 %v3722_v53  ;;  %v3734_v35 = vpack.c.bf16 %v2129_v55, %v2127_v45  ;;  %v2049_v45 = vld [vmem:[%s5373_s10] sm:$0x1] }
 0x5a6   :  { %3725 = vmatpush1.bf16.msra.mxu1 %v3724_v29 }
 0x5a7   :  { %v5055_v39 = vpop.f32.mrb[20].mxu0 }
 0x5a8   :  { %v5057_v58 = vpop.f32.mrb[21].mxu0  ;;  %v2130_v13 = vmul.f32 %v5055_v39, %v5055_v39 }
 0x5a9   :  { %v5059_v34 = vpop.f32.mrb[22].mxu0  ;;  %v2131_v47 = vmul.f32 %v5057_v58, %v5057_v58 }
 0x5aa   :  { %v3728_v62 = vpack.c.bf16 %v5059_v34, %v5055_v39  ;;  %v2132_v22 = vmul.f32 %v5059_v34, %v5059_v34  ;;  %v5067_v44 = vpop.f32.mrb[23].mxu0 }
 0x5ab   :  { %v3726_v21 = vpack.c.bf16 %v5067_v44, %v5057_v58  ;;  %v2133_v6 = vmul.f32 %v5067_v44, %v5067_v44 }
 0x5ac   :  { %v3740_v3 = vpack.c.bf16 %v2132_v22, %v2130_v13  ;;  %v4169_v13 = vld [vmem:[%s5366_s3] ss:$8 sps:$4 sm:$0xff]   ;;  %v4174_v22 = vld [vmem:[%s5366_s3 + $0x14] ss:$8 sps:$4 sm:$0xff]  }
 0x5ad   :  { %3727 = vmatprep.subr.bf16.mxu1 %v3726_v21  ;;  %v3738_v41 = vpack.c.bf16 %v2133_v6, %v2131_v47  ;;  %v4172_v47 = vld [vmem:[%s5366_s3 + $0x10] ss:$8 sps:$4 sm:$0xff]   ;;  %v4177_v21 = vld [vmem:[%s5366_s3 + $0x24] ss:$8 sps:$4 sm:$0xff]   ;;  %v4175_v6 = vld [vmem:[%s5366_s3 + $0x20] ss:$8 sps:$4 sm:$0xff]  }
 0x5ae   :  { %3729 = vmatpush1.bf16.msra.mxu1 %v3728_v62 }
 0x5af   :  { %3731 = vmatprep.subr.bf16.mxu1 %v3730_v49 }
 0x5b1   :  { %3396 = vmatmul.mubr.msk.f32.vlgmr.msra.gmra.mrb[12].mxu1 %vm654_vm2, %v5078_v31 }
 0x5b2   :  { %3733 = vmatpush1.bf16.msra.mxu1 %v3732_v0  ;;  %2198 = vmatprep.mubr.f32.mxu1 %v5395_v20 }
 0x5b3   :  { %3735 = vmatprep.subr.bf16.mxu1 %v3734_v35 }
 0x5b6   :  { %3737 = vmatpush1.bf16.msra.mxu1 %v3736_v50  ;;  %v2050_v50 = vld [vmem:[%s5374_s11] sm:$0x1] }
 0x5b7   :  { %3739 = vmatprep.subr.bf16.mxu1 %v3738_v41  ;;  %v4178_v41 = vld [vmem:[%s5366_s3 + $0x30] ss:$8 sps:$4 sm:$0xff]  }
 0x5ba   :  { %3741 = vmatpush1.bf16.msra.mxu1 %v3740_v3  ;;  %v4180_v3 = vld [vmem:[%s5366_s3 + $0x34] ss:$8 sps:$4 sm:$0xff]  }
 0x5bb   :  { %3743 = vmatprep.subr.bf16.mxu1 %v4577_v5 }
 0x5bd   :  { %3397 = vmatmul.mubr.msk.f32.vlgmr.msra.gmra.mrb[14].mxu1 %vm654_vm2, %v5078_v31 }
 0x5be   :  { %3745 = vmatpush3.bf16.msra.mxu1 %v4591_v14 }
 0x5bf   :  { %3747 = vmatprep.subr.bf16.mxu1 %v4594_v16 }
 0x5c2   :  { %3749 = vmatpush3.bf16.msra.mxu1 %v4610_v23 }
 0x5c3   :  { %3751 = vmatprep.subr.bf16.mxu1 %v4613_v25 }
 0x5c6   :  { %3753 = vmatpush3.bf16.msra.mxu1 %v4628_v32 }
 0x5c7   :  { %3755 = vmatprep.subr.bf16.mxu1 %v4631_v33 }
 0x5ca   :  { %3757 = vmatpush3.bf16.msra.mxu1 %v4646_v37 }
 0x5cb   :  { %3759 = vmatprep.subr.bf16.mxu1 %v4649_v38 }
 0x5ce   :  { %3761 = vmatpush3.bf16.msra.mxu1 %v4664_v46 }
 0x5cf   :  { %3763 = vmatprep.subr.bf16.mxu1 %v4667_v48 }
 0x5d2   :  { %3765 = vmatpush3.bf16.msra.mxu1 %v4682_v56 }
 0x5d3   :  { %3767 = vmatprep.subr.bf16.mxu1 %v4685_v57 }
 0x5d6   :  { %3769 = vmatpush3.bf16.msra.mxu1 %v4700_v63 }
 0x5d7   :  { %3771 = vmatprep.subr.bf16.mxu1 %v4703_v1 }
 0x5da   :  { %3773 = vmatpush3.bf16.msra.mxu1 %v4712_v4 }
 0x5db   :  { %3775 = vmatprep.subr.bf16.mxu1 %v4577_v5 }
 0x684   :  { %v2117_v2 = vpop.f32.mrb[12].mxu1 }
 0x685   :  { %v2119_v43 = vpop.f32.mrb[13].mxu1 }
 0x686   :  { %2269 = vmatprep.mubr.f32.mxu1 %v2119_v43  ;;  %v4181_v43 = vld [vmem:[%s5366_s3 + $0x40] ss:$8 sps:$4 sm:$0xff]  }
 0x687   :  { %2270 = vmatmul.mubr.f32.vlgmr.msra.gmra.mrb[16].mxu1 %v2117_v2  ;;  %v4183_v2 = vld [vmem:[%s5366_s3 + $0x44] ss:$8 sps:$4 sm:$0xff]  }
 0x688   :  { %3777 = vmatpush3.bf16.msra.mxu1 %v4591_v14 }
 0x689   :  { %3779 = vmatprep.subr.bf16.mxu1 %v4594_v16 }
 0x68c   :  { %3781 = vmatpush3.bf16.msra.mxu1 %v4610_v23 }
 0x68d   :  { %3783 = vmatprep.subr.bf16.mxu1 %v4613_v25 }
 0x690   :  { %3785 = vmatpush3.bf16.msra.mxu1 %v4628_v32  ;;  %v2200_v28 = vpop.f32.mrb[14].mxu1 }
 0x691   :  { %3787 = vmatprep.subr.bf16.mxu1 %v4631_v33  ;;  %v2202_v27 = vpop.f32.mrb[15].mxu1 }
 0x692   :  { %2340 = vmatprep.mubr.f32.mxu1 %v2202_v27  ;;  %v4184_v27 = vld [vmem:[%s5366_s3 + $0x50] ss:$8 sps:$4 sm:$0xff]  }
 0x694   :  { %3789 = vmatpush3.bf16.msra.mxu1 %v4646_v37 }
 0x695   :  { %3791 = vmatprep.subr.bf16.mxu1 %v4649_v38 }
 0x698   :  { %3793 = vmatpush3.bf16.msra.mxu1 %v4664_v46 }
 0x699   :  { %3795 = vmatprep.subr.bf16.mxu1 %v4667_v48 }
 0x69c   :  { %3797 = vmatpush3.bf16.msra.mxu1 %v4682_v56 }
 0x69d   :  { %3799 = vmatprep.subr.bf16.mxu1 %v4685_v57 }
 0x6a0   :  { %3801 = vmatpush3.bf16.msra.mxu1 %v4700_v63 }
 0x6a1   :  { %3803 = vmatprep.subr.bf16.mxu1 %v4703_v1 }
 0x6a4   :  { %3805 = vmatpush3.bf16.msra.mxu1 %v4712_v4 }
 0x6a5   :  { %2357 = vmatprep.subr.mxu1 %v4736_v17 }
 0x6a7   :  { %2341 = vmatmul.mubr.f32.vlgmr.msra.gmra.mrb[18].mxu1 %v2200_v28  ;;  %v4186_v28 = vld [vmem:[%s5366_s3 + $0x54] ss:$8 sps:$4 sm:$0xff]  }
 0x6a8   :  { %2358 = vmatpush1.msra.mxu1 %v4741_v18  ;;  %2421 = vmatprep.mubr.f32.mxu1 %v5395_v20 }
 0x6a9   :  { %2431 = vmatprep.subr.mxu1 %v4736_v17  ;;  %v4171_v17 = vld [vmem:[%s5366_s3 + $0x4] ss:$8 sps:$4 sm:$0xff]  }
 0x75a   :  { %v3522_v59 = vpop.f32.mrb[16].mxu1 }
 0x75b   :  { %v3523_v7 = vpop.f32.mrb[17].mxu1 }
 0x75c   :  { %v3524_v9 = vadd.f32 %v3523_v7, %v3522_v59  ;;  %v4189_v59 = vld [vmem:[%s5366_s3 + $0x64] ss:$8 sps:$4 sm:$0xff]   ;;  %v4187_v7 = vld [vmem:[%s5366_s3 + $0x60] ss:$8 sps:$4 sm:$0xff]  }
 0x75e   :  { %v2275_v15 = vmul.f32 0.001953125, %v3524_v9  ;;  %v4192_v9 = vld [vmem:[%s5366_s3 + $0x74] ss:$8 sps:$4 sm:$0xff]  }
 0x760   :  { %v2347_v49 = vmul.f32 %v2275_v15, %v2275_v15 }
 0x77a   :  { %v3557_v54 = vpop.f32.mrb[18].mxu1 }
 0x77b   :  { %v3558_v10 = vpop.f32.mrb[19].mxu1 }
 0x77c   :  { %v3559_v0 = vadd.f32 %v3558_v10, %v3557_v54 }
 0x77e   :  { %v2346_v36 = vmul.f32 0.001953125, %v3559_v0 }
 0x780   :  { %v2348_v29 = vsub.f32 %v2346_v36, %v2347_v49 }
 0x782   :  { %v2349_v40 = vadd.f32 1e-05, %v2348_v29 }
 0x784   :  { %4195 = vrsqrt.f32 %v2349_v40 }
 0x78e   :  { %v4196_v53 = vpop.eup %4195 }
 0x78f   :  { %v2351_v55 = vmul.f32 %v4196_v53, %v2049_v45 }
 0x791   :  { %3398 = vmatmul.mubr.msk.f32.vlgmr.msra.gmra.mrb[20].mxu1 %vm961_vm3, %v2351_v55  ;;  %v2352_v35 = vmul.f32 %v2351_v55, %v2275_v15  ;;  %v4190_v15 = vld [vmem:[%s5366_s3 + $0x70] ss:$8 sps:$4 sm:$0xff]  }
 0x792   :  { %2432 = vmatpush1.msra.mxu1 %v4741_v18  ;;  %2495 = vmatprep.mubr.f32.mxu1 %v5395_v20  ;;  %v5396_v18 = vmov 0  }
 0x793   :  { %2638 = vmatprep.subr.bf16.mxu1 %v4171_v17  ;;  %v2353_v62 = vsub.f32 %v2050_v50, %v2352_v35 }
 0x795   :  { %3399 = vmatmul.mubr.msk.f32.vlgmr.msra.gmra.mrb[22].mxu1 %vm961_vm3, %v2353_v62 }
 0x796   :  { %2639 = vmatpush1.bf16.msra.mxu1 %v4169_v13  ;;  %2670 = vmatprep.mubr.bf16.mxu1 %v5396_v18 }
 0x797   :  { %2640 = vmatprep.subr.bf16.mxu1 %v4174_v22 }
 0x79a   :  { %2641 = vmatpush1.bf16.msra.mxu1 %v4172_v47 }
 0x79b   :  { %2642 = vmatprep.subr.bf16.mxu1 %v4177_v21 }
 0x79e   :  { %2643 = vmatpush1.bf16.msra.mxu1 %v4175_v6 }
 0x79f   :  { %2644 = vmatprep.subr.bf16.mxu1 %v4180_v3 }
 0x7a2   :  { %2645 = vmatpush1.bf16.msra.mxu1 %v4178_v41 }
 0x7a3   :  { %2646 = vmatprep.subr.bf16.mxu1 %v4183_v2 }
 0x7a6   :  { %2647 = vmatpush1.bf16.msra.mxu1 %v4181_v43 }
 0x7a7   :  { %2648 = vmatprep.subr.bf16.mxu1 %v4186_v28 }
 0x7aa   :  { %2649 = vmatpush1.bf16.msra.mxu1 %v4184_v27 }
 0x7ab   :  { %2650 = vmatprep.subr.bf16.mxu1 %v4189_v59 }
 0x7ae   :  { %2651 = vmatpush1.bf16.msra.mxu1 %v4187_v7 }
 0x7af   :  { %2652 = vmatprep.subr.bf16.mxu1 %v4192_v9 }
 0x7b2   :  { %2653 = vmatpush1.bf16.msra.mxu1 %v4190_v15 }
 0x7b5   :  { %2671 = vmatmul.mubr.bf16.vlgmr.msra.gmra.mrb[24].mxu1 %v4478_v11 }
 0x7b6   :  { %2680 = vmatprep.mubr.bf16.mxu1 %v5396_v18 }
 0x7bd   :  { %2681 = vmatmul.mubr.bf16.gmra.mrb[28].mxu1 %v4484_v19 }
 0x7be   :  { %2690 = vmatprep.mubr.bf16.mxu1 %v5396_v18 }
 0x7c5   :  { %2691 = vmatmul.mubr.bf16.gmra.mrb[32].mxu1 %v4490_v24 }
 0x7c6   :  { %2767 = vmatprep.mubr.f32.mxu1 %v5395_v20 }
 0x864   :  { %v2423_v54 = vpop.f32.mrb[20].mxu1 }
 0x865   :  { %v2505_v10 = vrot.slane %v2423_v54, %v4776_v12  ;;  %v2425_v0 = vpop.f32.mrb[21].mxu1 }
 0x866   :  { %v2509_v49 = vrot.slane %v2425_v0, %v4776_v12 }
 0x867   :  { %v2510_v36 = vmul.f32 %v2505_v10, %v5015_v52  ;;  %v2512_v11 = vmul.f32 %v2505_v10, %v5019_v61  ;;  %v2514_v29 = vmul.f32 %v2505_v10, %v5035_v51  ;;  %v2516_v19 = vmul.f32 %v2505_v10, %v5039_v26 }
 0x868   :  { %v2518_v40 = vmul.f32 %v2505_v10, %v5055_v39  ;;  %v2520_v24 = vmul.f32 %v2505_v10, %v5059_v34  ;;  %v2511_v45 = vmul.f32 %v2509_v49, %v5017_v60  ;;  %v2513_v53 = vmul.f32 %v2509_v49, %v5027_v8  ;;  %v2497_v55 = vpop.f32.mrb[22].mxu1 }
 0x869   :  { %v2515_v17 = vmul.f32 %v2509_v49, %v5037_v30  ;;  %v2517_v50 = vmul.f32 %v2509_v49, %v5047_v42  ;;  %v2519_v52 = vmul.f32 %v2509_v49, %v5057_v58  ;;  %v2521_v61 = vmul.f32 %v2509_v49, %v5067_v44  ;;  %v2499_v51 = vpop.f32.mrb[23].mxu1 }
 0x86a   :  { %v2525_v26 = vrot.slane %v2497_v55, %v4776_v12  ;;  %v2529_v39 = vrot.slane %v2499_v51, %v4776_v12 }
 0x86c   :  { %v5202_v35 = vadd.f32 %v2525_v26, %v2510_v36  ;;  %v5204_v34 = vadd.f32 %v2525_v26, %v2512_v11  ;;  %v5206_v60 = vadd.f32 %v2525_v26, %v2514_v29  ;;  %v5208_v8 = vadd.f32 %v2525_v26, %v2516_v19 }
 0x86d   :  { %v5210_v30 = vadd.f32 %v2525_v26, %v2518_v40  ;;  %v5212_v42 = vadd.f32 %v2525_v26, %v2520_v24  ;;  %v5214_v58 = vadd.f32 %v2529_v39, %v2511_v45  ;;  %v5216_v44 = vadd.f32 %v2529_v39, %v2513_v53 }
 0x86e   :  { %v5218_v13 = vadd.f32 %v2529_v39, %v2515_v17  ;;  %v5220_v62 = vadd.f32 %v2529_v39, %v2517_v50  ;;  %v5222_v22 = vadd.f32 %v2529_v39, %v2519_v52  ;;  %v5224_v47 = vadd.f32 %v2529_v39, %v2521_v61 }
 0x888   :  { %v5226_v18 = vpop.f32.mrb[24].mxu1 }
 0x889   :  { %v5228_v21 = vpop.f32.mrb[25].mxu1  ;;  %v2774_v3 = vmul.f32 %v5226_v18, %v5226_v18 }
 0x88a   :  { %v5230_v6 = vpop.f32.mrb[26].mxu1  ;;  %v2775_v28 = vmul.f32 %v5228_v21, %v5228_v21 }
 0x88b   :  { %v3808_v41 = vpack.c.bf16 %v5230_v6, %v5226_v18  ;;  %v2776_v2 = vmul.f32 %v5230_v6, %v5230_v6  ;;  %v5238_v43 = vpop.f32.mrb[27].mxu1 }
 0x88c   :  { %v3806_v27 = vpack.c.bf16 %v5238_v43, %v5228_v21  ;;  %v2777_v59 = vmul.f32 %v5238_v43, %v5238_v43 }
 0x88d   :  { %v3820_v7 = vpack.c.bf16 %v2776_v2, %v2774_v3 }
 0x88e   :  { %3807 = vmatprep.subr.bf16.mxu1 %v3806_v27  ;;  %v3818_v9 = vpack.c.bf16 %v2777_v59, %v2775_v28  ;;  %v2701_v28 = vld [vmem:[%s5375_s12] sm:$0x1]  ;;  %s4280_s12 = smov [#allocation7]  }
 0x88f   :  { %3809 = vmatpush1.bf16.msra.mxu1 %v3808_v41 }
 0x890   :  { %v5246_v15 = vpop.f32.mrb[28].mxu1 }
 0x891   :  { %v5248_v54 = vpop.f32.mrb[29].mxu1  ;;  %v2778_v0 = vmul.f32 %v5246_v15, %v5246_v15 }
 0x892   :  { %v5250_v10 = vpop.f32.mrb[30].mxu1  ;;  %v2779_v29 = vmul.f32 %v5248_v54, %v5248_v54 }
 0x893   :  { %v3812_v49 = vpack.c.bf16 %v5250_v10, %v5246_v15  ;;  %v2780_v36 = vmul.f32 %v5250_v10, %v5250_v10  ;;  %v5258_v11 = vpop.f32.mrb[31].mxu1 }
 0x894   :  { %v3810_v19 = vpack.c.bf16 %v5258_v11, %v5248_v54  ;;  %v2781_v40 = vmul.f32 %v5258_v11, %v5258_v11 }
 0x895   :  { %v3824_v24 = vpack.c.bf16 %v2780_v36, %v2778_v0 }
 0x896   :  { %3811 = vmatprep.subr.bf16.mxu1 %v3810_v19  ;;  %v3822_v45 = vpack.c.bf16 %v2781_v40, %v2779_v29 }
 0x897   :  { %3813 = vmatpush1.bf16.msra.mxu1 %v3812_v49 }
 0x898   :  { %v5266_v53 = vpop.f32.mrb[32].mxu1 }
 0x899   :  { %v5268_v55 = vpop.f32.mrb[33].mxu1  ;;  %v2782_v50 = vmul.f32 %v5266_v53, %v5266_v53 }
 0x89a   :  { %v5270_v17 = vpop.f32.mrb[34].mxu1  ;;  %v2783_v26 = vmul.f32 %v5268_v55, %v5268_v55 }
 0x89b   :  { %v3816_v52 = vpack.c.bf16 %v5270_v17, %v5266_v53  ;;  %v2784_v61 = vmul.f32 %v5270_v17, %v5270_v17  ;;  %v5278_v51 = vpop.f32.mrb[35].mxu1 }
 0x89c   :  { %v3814_v39 = vpack.c.bf16 %v5278_v51, %v5268_v55  ;;  %v2785_v3 = vmul.f32 %v5278_v51, %v5278_v51 }
 0x89d   :  { %v3828_v41 = vpack.c.bf16 %v2784_v61, %v2782_v50 }
 0x89e   :  { %3815 = vmatprep.subr.bf16.mxu1 %v3814_v39  ;;  %v3826_v2 = vpack.c.bf16 %v2785_v3, %v2783_v26 }
 0x89f   :  { %3817 = vmatpush1.bf16.msra.mxu1 %v3816_v52 }
 0x8a0   :  { %3819 = vmatprep.subr.bf16.mxu1 %v3818_v9 }
 0x8a2   :  { %3416 = vmatmul.mubr.msk.f32.vlgmr.msra.gmra.mrb[36].mxu1 %vm654_vm2, %v5078_v31 }
 0x8a3   :  { %3821 = vmatpush1.bf16.msra.mxu1 %v3820_v7  ;;  %2850 = vmatprep.mubr.f32.mxu1 %v5395_v20  ;;  %v2702_v7 = vld [vmem:[%s5376_s13] sm:$0x1]  ;;  %s3235_s13 = sshll.u32 %s4280_s12, 4  ;;  %s3236_s13 = int_to_ptr.vmem [resolvable:$true] %s3235_s13 }
 0x8a4   :  { %3823 = vmatprep.subr.bf16.mxu1 %v3822_v45  ;;  %s4246_s18 = scalar_lea.vmem %s3236_s13, 1536  ;;  %p4251_p3 = scmp.lt.s32.totalorder %s3236_s13, %s3236_s13 }
 0x8a5   :  { %p4247_p2 = scmp.ne.s32.totalorder %s3236_s13, %s4246_s18  ;;  %p4252_p4 = scmp.lt.s32.totalorder %s4246_s18, %s4246_s18 }
 0x8a7   :  { %3825 = vmatpush1.bf16.msra.mxu1 %v3824_v24  ;;  %p4253_p5 = por %p4252_p4, %p4251_p3 }
 0x8a8   :  { %3827 = vmatprep.subr.bf16.mxu1 %v3826_v2 }
 0x8a9   :  { %p4254_p6 = pnand %p4253_p5, %p4247_p2 }
 0x8ab   :  { %3829 = vmatpush1.bf16.msra.mxu1 %v3828_v41 }
 0x8ac   :  { %3831 = vmatprep.subr.bf16.mxu1 %v4577_v5  ;;  %v4200_v5 = vld [vmem:[%s5368_s5 + $0x8] sm:$0xff] }
 0x8ae   :  { %3417 = vmatmul.mubr.msk.f32.vlgmr.msra.gmra.mrb[38].mxu1 %vm654_vm2, %v5078_v31 }
 0x8af   :  { %3833 = vmatpush3.bf16.msra.mxu1 %v4591_v14 }
 0x8b0   :  { %3835 = vmatprep.subr.bf16.mxu1 %v4594_v16 }
 0x8b3   :  { %3837 = vmatpush3.bf16.msra.mxu1 %v4610_v23  ;;  %v4201_v23 = vld [vmem:[%s5368_s5] sm:$0xff] }
 0x8b4   :  { %3839 = vmatprep.subr.bf16.mxu1 %v4613_v25 }
 0x8b7   :  { %3841 = vmatpush3.bf16.msra.mxu1 %v4628_v32 }
 0x8b8   :  { %3843 = vmatprep.subr.bf16.mxu1 %v4631_v33 }
 0x8bb   :  { %3845 = vmatpush3.bf16.msra.mxu1 %v4646_v37 }
 0x8bc   :  { %3847 = vmatprep.subr.bf16.mxu1 %v4649_v38 }
 0x8bf   :  { %3849 = vmatpush3.bf16.msra.mxu1 %v4664_v46 }
 0x8c0   :  { %3851 = vmatprep.subr.bf16.mxu1 %v4667_v48 }
 0x8c3   :  { %3853 = vmatpush3.bf16.msra.mxu1 %v4682_v56 }
 0x8c4   :  { %3855 = vmatprep.subr.bf16.mxu1 %v4685_v57 }
 0x8c7   :  { %3857 = vmatpush3.bf16.msra.mxu1 %v4700_v63 }
 0x8c8   :  { %3859 = vmatprep.subr.bf16.mxu1 %v4703_v1 }
 0x8cb   :  { %3861 = vmatpush3.bf16.msra.mxu1 %v4712_v4 }
 0x8cc   :  { %3009 = vmatprep.subr.mxu1 %v4200_v5 }
 0x975   :  { %v2769_v14 = vpop.f32.mrb[36].mxu1 }
 0x976   :  { %v2771_v16 = vpop.f32.mrb[37].mxu1 }
 0x977   :  { %2921 = vmatprep.mubr.f32.mxu1 %v2771_v16 }
 0x978   :  { %2922 = vmatmul.mubr.f32.vlgmr.msra.gmra.mrb[40].mxu1 %v2769_v14 }
 0x979   :  { %3010 = vmatpush1.msra.mxu1 %v4201_v23  ;;  %3073 = vmatprep.mubr.f32.mxu1 %v5395_v20 }
 0x97a   :  { %3083 = vmatprep.subr.mxu1 %v4200_v5 }
 0x981   :  { %v2852_v25 = vpop.f32.mrb[38].mxu1 }
 0x982   :  { %v2854_v32 = vpop.f32.mrb[39].mxu1 }
 0x983   :  { %2992 = vmatprep.mubr.f32.mxu0 %v2854_v32 }
 0x984   :  { %2993 = vmatmul.mubr.f32.vlgmr.msra.gmra.mrb[24].mxu0 %v2852_v25 }
 0xa4b   :  { %v3592_v33 = vpop.f32.mrb[40].mxu1 }
 0xa4c   :  { %v3593_v37 = vpop.f32.mrb[41].mxu1 }
 0xa4d   :  { %v3594_v38 = vadd.f32 %v3593_v37, %v3592_v33 }
 0xa4f   :  { %v2927_v46 = vmul.f32 0.001953125, %v3594_v38 }
 0xa51   :  { %v2999_v63 = vmul.f32 %v2927_v46, %v2927_v46 }
 0xa57   :  { %v3627_v48 = vpop.f32.mrb[24].mxu0 }
 0xa58   :  { %v3628_v56 = vpop.f32.mrb[25].mxu0 }
 0xa59   :  { %v3629_v57 = vadd.f32 %v3628_v56, %v3627_v48 }
 0xa5b   :  { %v2998_v1 = vmul.f32 0.001953125, %v3629_v57 }
 0xa5d   :  { %v3000_v4 = vsub.f32 %v2998_v1, %v2999_v63 }
 0xa5f   :  { %v3001_v31 = vadd.f32 1e-05, %v3000_v4 }
 0xa61   :  { %4197 = vrsqrt.f32 %v3001_v31 }
 0xa6b   :  { %v4198_v27 = vpop.eup %4197 }
 0xa6c   :  { %v3003_v59 = vmul.f32 %v4198_v27, %v2701_v28 }
 0xa6e   :  { %3418 = vmatmul.mubr.msk.f32.vlgmr.msra.gmra.mrb[42].mxu1 %vm961_vm3, %v3003_v59  ;;  %v3004_v9 = vmul.f32 %v3003_v59, %v2927_v46 }
 0xa6f   :  { %3084 = vmatpush1.msra.mxu1 %v4201_v23  ;;  %3147 = vmatprep.mubr.f32.mxu1 %v5395_v20 }
 0xa70   :  { %v3005_v0 = vsub.f32 %v2702_v7, %v3004_v9 }
 0xa72   :  { %3419 = vmatmul.mubr.msk.f32.vlgmr.msra.gmra.mrb[44].mxu1 %vm961_vm3, %v3005_v0 }
 0xb41   :  { %v3075_v49 = vpop.f32.mrb[42].mxu1 }
 0xb42   :  { %v3157_v36 = vrot.slane %v3075_v49, %v4776_v12  ;;  %v3077_v29 = vpop.f32.mrb[43].mxu1 }
 0xb43   :  { %v3161_v19 = vrot.slane %v3077_v29, %v4776_v12 }
 0xb44   :  { %v3162_v40 = vmul.f32 %v3157_v36, %v5226_v18  ;;  %v3164_v24 = vmul.f32 %v3157_v36, %v5230_v6  ;;  %v3166_v45 = vmul.f32 %v3157_v36, %v5246_v15  ;;  %v3168_v50 = vmul.f32 %v3157_v36, %v5250_v10 }
 0xb45   :  { %v3170_v52 = vmul.f32 %v3157_v36, %v5266_v53  ;;  %v3172_v20 = vmul.f32 %v3157_v36, %v5270_v17  ;;  %v3163_v61 = vmul.f32 %v3161_v19, %v5228_v21  ;;  %v3165_v26 = vmul.f32 %v3161_v19, %v5238_v43  ;;  %v3149_v39 = vpop.f32.mrb[44].mxu1 }
 0xb46   :  { %v3167_v3 = vmul.f32 %v3161_v19, %v5248_v54  ;;  %v3169_v41 = vmul.f32 %v3161_v19, %v5258_v11  ;;  %v3171_v18 = vmul.f32 %v3161_v19, %v5268_v55  ;;  %v3173_v6 = vmul.f32 %v3161_v19, %v5278_v51  ;;  %v3151_v15 = vpop.f32.mrb[45].mxu1 }
 0xb47   :  { %v3177_v10 = vrot.slane %v3149_v39, %v4776_v12  ;;  %v3181_v53 = vrot.slane %v3151_v15, %v4776_v12 }
 0xb49   :  { %v3182_v2 = vadd.f32 %v3177_v10, %v3162_v40  ;;  %v3184_v17 = vadd.f32 %v3177_v10, %v3164_v24  ;;  %v3186_v5 = vadd.f32 %v3177_v10, %v3166_v45  ;;  %v3188_v21 = vadd.f32 %v3177_v10, %v3168_v50 }
 0xb4a   :  { %v3190_v14 = vadd.f32 %v3177_v10, %v3170_v52  ;;  %v3192_v43 = vadd.f32 %v3177_v10, %v3172_v20  ;;  %v3183_v16 = vadd.f32 %v3181_v53, %v3163_v61  ;;  %v3185_v23 = vadd.f32 %v3181_v53, %v3165_v26 }
 0xb4b   :  { %v3194_v54 = vadd.f32 %v3182_v2, %v5202_v35  ;;  %v3196_v11 = vadd.f32 %v3184_v17, %v5204_v34  ;;  %v3198_v55 = vadd.f32 %v3186_v5, %v5206_v60  ;;  %v3200_v51 = vadd.f32 %v3188_v21, %v5208_v8 }
 0xb4c   :  { %v3202_v25 = vadd.f32 %v3190_v14, %v5210_v30  ;;  %v3204_v12 = vadd.f32 %v3192_v43, %v5212_v42  ;;  %v3187_v32 = vadd.f32 %v3181_v53, %v3167_v3  ;;  %v3189_v33 = vadd.f32 %v3181_v53, %v3169_v41 }
 0xb4d   :  { %v3206_v37 = vmax.f32 %v3194_v54, 0.0  ;;  %v3208_v38 = vmax.f32 %v3196_v11, 0.0  ;;  %v3210_v46 = vmax.f32 %v3198_v55, 0.0  ;;  %v3212_v48 = vmax.f32 %v3200_v51, 0.0 }
 0xb4e   :  { %v3214_v56 = vmax.f32 %v3202_v25, 0.0  ;;  %v3216_v57 = vmax.f32 %v3204_v12, 0.0  ;;  %v3191_v63 = vadd.f32 %v3181_v53, %v3171_v18  ;;  %v3193_v35 = vadd.f32 %v3181_v53, %v3173_v6 }
 0xb4f   :  { %3218 = vst [vmem:[#allocation7] sm:$0xff] %v3206_v37  ;;  %3220 = vst [vmem:[#allocation7 + $0x10] sm:$0xff] %v3208_v38  ;;  %v3195_v34 = vadd.f32 %v3183_v16, %v5214_v58  ;;  %v3197_v60 = vadd.f32 %v3185_v23, %v5216_v44  ;;  %v3199_v8 = vadd.f32 %v3187_v32, %v5218_v13 }
 0xb50   :  { %3222 = vst [vmem:[#allocation7 + $0x20] sm:$0xff] %v3210_v46  ;;  %3224 = vst [vmem:[#allocation7 + $0x30] sm:$0xff] %v3212_v48  ;;  %v3201_v30 = vadd.f32 %v3189_v33, %v5220_v62  ;;  %v3203_v42 = vadd.f32 %v3191_v63, %v5222_v22  ;;  %v3205_v1 = vadd.f32 %v3193_v35, %v5224_v47 }
 0xb51   :  { %3226 = vst [vmem:[#allocation7 + $0x40] sm:$0xff] %v3214_v56  ;;  %3228 = vst [vmem:[#allocation7 + $0x50] sm:$0xff] %v3216_v57  ;;  %v3207_v4 = vmax.f32 %v3195_v34, 0.0  ;;  %v3209_v31 = vmax.f32 %v3197_v60, 0.0  ;;  %v3211_v28 = vmax.f32 %v3199_v8, 0.0 }
 0xb52   :  { %v3213_v27 = vmax.f32 %v3201_v30, 0.0  ;;  %v3215_v59 = vmax.f32 %v3203_v42, 0.0  ;;  %v3217_v7 = vmax.f32 %v3205_v1, 0.0 }
 0xb53   :  { %3219 = vst [vmem:[#allocation7 + $0x8] sm:$0xff] %v3207_v4  ;;  %3221 = vst [vmem:[#allocation7 + $0x18] sm:$0xff] %v3209_v31 }
 0xb54   :  { %3223 = vst [vmem:[#allocation7 + $0x28] sm:$0xff] %v3211_v28  ;;  %3225 = vst [vmem:[#allocation7 + $0x38] sm:$0xff] %v3213_v27 }
 0xb55   :  { %3227 = vst [vmem:[#allocation7 + $0x48] sm:$0xff] %v3215_v59  ;;  %3229 = vst [vmem:[#allocation7 + $0x58] sm:$0xff] %v3217_v7 }
 0xb56   :  { %4257 = shalt.err (!%p4254_p6)
}
 0xb57   :  { %s4258_s21 = scalar_lea.hbm %s5377_s14, 1536 }
 0xb58   :  { %p4259_p7 = scmp.ne.s32.totalorder %s5377_s14, %s4258_s21  ;;  %p4262_p8 = scmp.lt.u32.totalorder %s4258_s21, %s5377_s14 }
 0xb5a   :  { %p4264_p9 = pnand %p4262_p8, %p4259_p7 }
 0xb5c   :  { %4267 = shalt.err (!%p4264_p9)
}
 0xb5d   :  { %s4281_s8 = smov 256   ;;  %s4282_s9 = smov 16  }
 0xb5e   :  { %3241 = dma.vmem_to_hbm [thread:$0]  %s3236_s13, 1536, %s5377_s14, [#allocation4], %s4281_s8, %s4281_s8, %s4282_s9  }
 0xb5f   :  { %4272 = dma.done.wait [#allocation4], 1536  }
 0xb60   :  { %4273 = vsyncadd [#allocation4], 4294965760 }
 0xb61   :  { %3245 = vsyncpa [#allocation3], 1 }
 0xb62   :  { %3246 = vsyncpa [#allocation6], 1 }
 0xb63   :  { %3247 = vsyncpa [#allocation4], 1 }

</bundles_post_ra>
